<compile_context>
chip_gen: v5e
topology: v5e:2x2
jax: 0.10.0
libtpu: 0.0.40
codegen_flags: <defaults>
</compile_context>

<pallas_src>
import math
from functools import partial, lru_cache

import jax
import jax.numpy as jnp
from jax.experimental import pallas as pl
from jax.experimental.pallas import tpu as pltpu


# --------------------------- tile-size helpers ----------------------------- #

@lru_cache(maxsize=None)
def _vmem_budget_bytes():
    """Per-kernel VMEM budget: half the physical VMEM, capped, with a safe
    fallback when the hardware query is unavailable."""
    try:
        cap = pltpu.get_tpu_info().vmem_capacity_bytes
    except Exception:  # pragma: no cover - conservative fallback
        cap = 64 << 20
    return int(max(16 << 20, min(cap // 2, 64 << 20)))


def _pick_row_tile(dim, target=512):
    """Sublane (second-to-last) tile: multiple of 16 dividing dim, or full."""
    if dim <= target:
        return dim
    for t in range(target - target % 16, 15, -16):
        if dim % t == 0:
            return t
    return dim


def _pick_col_tile(dim, target=512):
    """Lane (last) tile: multiple of 128 dividing dim, or full."""
    if dim <= target:
        return dim
    for t in range(target - target % 128, 127, -128):
        if dim % t == 0:
            return t
    return dim


def _shrink_to_fit(t, bytes_fn, budget):
    """Halve a row tile (keeping it a multiple of 8 and a divisor of the dim)
    until the estimated working set fits the VMEM budget."""
    while t > 8 and t % 16 == 0 and bytes_fn(t) > budget:
        t //= 2
    return t


def _heads_per_block(num_heads, head_dim):
    """Smallest head group whose lane width is a multiple of 128 (lane-dense);
    fallback: smallest group with >= 128 lanes (caps the per-block unroll);
    last resort: all heads (block == full hidden dim, always legal)."""
    for cand in range(1, num_heads + 1):
        if num_heads % cand == 0 and (cand * head_dim) % 128 == 0:
            return cand
    for cand in range(1, num_heads + 1):
        if num_heads % cand == 0 and cand * head_dim >= 128:
            return cand
    return num_heads


def _gelu_tanh(y):
    return 0.5 * y * (1.0 + jnp.tanh(0.7978845608028654 * (y + 0.044715 * y * y * y)))


# ------------------------------- kernels ----------------------------------- #

def _ln_stats(x_f32, g, b, eps):
    mean = jnp.mean(x_f32, axis=-1, keepdims=True)
    var = jnp.mean(jnp.square(x_f32 - mean), axis=-1, keepdims=True)
    return (x_f32 - mean) * jax.lax.rsqrt(var + eps) * g + b


def _ln_qkv_kernel(x_ref, g_ref, bt_ref, wq_ref, bq_ref, wk_ref, bk_ref,
                   wv_ref, bv_ref, q_ref, k_ref, v_ref, h_scratch,
                   *, eps, q_scale):
    # LayerNorm prologue computed once per row tile (cached across column tiles).
    @pl.when(pl.program_id(1) == 0)
    def _():
        h = _ln_stats(x_ref[...].astype(jnp.float32), g_ref[...], bt_ref[...], eps)
        h_scratch[...] = h.astype(h_scratch.dtype)

    h = h_scratch[...]
    # Three projections share the single LHS tile (fused QKV).
    q = jnp.dot(h, wq_ref[...], preferred_element_type=jnp.float32) + bq_ref[...]
    q_ref[...] = (q * q_scale).astype(q_ref.dtype)          # fold 1/sqrt(d) into Q
    k = jnp.dot(h, wk_ref[...], preferred_element_type=jnp.float32) + bk_ref[...]
    k_ref[...] = k.astype(k_ref.dtype)
    v = jnp.dot(h, wv_ref[...], preferred_element_type=jnp.float32) + bv_ref[...]
    v_ref[...] = v.astype(v_ref.dtype)


def _attention_kernel(q_ref, k_ref, v_ref, m_ref, o_ref, *, head_dim):
    mask = m_ref[...].astype(jnp.float32)                   # (1, S) additive mask
    q_all = q_ref[...]                                      # (tq, blk); Q pre-scaled
    k_all = k_ref[...]                                      # (S, blk)
    v_all = v_ref[...]
    hpb = q_all.shape[-1] // head_dim
    outs = []
    for h in range(hpb):
        lo, hi = h * head_dim, (h + 1) * head_dim
        qh = q_all[:, lo:hi]
        kh = k_all[:, lo:hi]
        vh = v_all[:, lo:hi]
        s = jax.lax.dot_general(qh, kh, (((1,), (1,)), ((), ())),
                                preferred_element_type=jnp.float32)
        s = s + mask
        s = s - jnp.max(s, axis=-1, keepdims=True)
        p = jnp.exp(s)
        p = p / jnp.sum(p, axis=-1, keepdims=True)           # exact normalization
        outs.append(jnp.dot(p.astype(vh.dtype), vh,
                            preferred_element_type=jnp.float32))
    # Single lane-dense store for the whole head group.
    o_ref[...] = jnp.concatenate(outs, axis=-1).astype(o_ref.dtype)


def _out_proj_kernel(x_ref, w_ref, b_ref, r_ref, o_ref):
    y = jnp.dot(x_ref[...], w_ref[...], preferred_element_type=jnp.float32)
    y = y + b_ref[...] + r_ref[...].astype(jnp.float32)
    o_ref[...] = y.astype(o_ref.dtype)


def _ln_ffn_kernel(x_ref, g_ref, bt_ref, w1_ref, b1_ref, w2_ref, b2_ref,
                   o_ref, h_scratch, acc_scratch, *, eps):
    j = pl.program_id(1)

    @pl.when(j == 0)
    def _():
        h = _ln_stats(x_ref[...].astype(jnp.float32), g_ref[...], bt_ref[...], eps)
        h_scratch[...] = h.astype(h_scratch.dtype)
        acc_scratch[...] = jnp.zeros_like(acc_scratch)

    t = jnp.dot(h_scratch[...], w1_ref[...], preferred_element_type=jnp.float32)
    t = _gelu_tanh(t + b1_ref[...])
    acc_scratch[...] += jnp.dot(t.astype(w2_ref.dtype), w2_ref[...],
                                preferred_element_type=jnp.float32)

    @pl.when(j == pl.num_programs(1) - 1)
    def _():
        y = acc_scratch[...] + b2_ref[...] + x_ref[...].astype(jnp.float32)
        o_ref[...] = y.astype(o_ref.dtype)


def _layernorm_kernel(x_ref, g_ref, b_ref, o_ref, *, eps):
    y = _ln_stats(x_ref[...].astype(jnp.float32), g_ref[...], b_ref[...], eps)
    o_ref[...] = y.astype(o_ref.dtype)


# ------------------------------- wrappers ----------------------------------- #

def ln_qkv_proj(x, g, b, wq, bq, wk, bk, wv, bv, *, eps, q_scale):
    M, H = x.shape
    cd = x.dtype
    dsz = jnp.dtype(cd).itemsize
    budget = _vmem_budget_bytes()

    # Make the three H x H weights VMEM-resident when they fit comfortably:
    # single column step, constant block index => weights streamed once.
    resident = 3 * 2 * H * H * dsz <= budget // 2
    tn = H if resident else _pick_col_tile(H)

    fixed = 3 * 2 * H * tn * dsz + 3 * 2 * tn * 4            # weight + bias tiles
    row_bytes = (2 * H * dsz                                  # x tile (dbl-buffered)
                 + H * dsz                                    # LN scratch
                 + 3 * 2 * tn * dsz)                          # q/k/v out tiles
    tm = _shrink_to_fit(_pick_row_tile(M), lambda t: fixed + t * row_bytes, budget)

    row_spec = pl.BlockSpec((tm, H), lambda i, j: (i, 0))
    ln_spec = pl.BlockSpec((1, H), lambda i, j: (0, 0))
    w_spec = pl.BlockSpec((H, tn), lambda i, j: (0, j))
    b_spec = pl.BlockSpec((1, tn), lambda i, j: (0, j))
    out_spec = pl.BlockSpec((tm, tn), lambda i, j: (i, j))
    out = jax.ShapeDtypeStruct((M, H), x.dtype)
    return pl.pallas_call(
        partial(_ln_qkv_kernel, eps=eps, q_scale=q_scale),
        out_shape=(out, out, out),
        grid=(M // tm, H // tn),
        in_specs=[row_spec, ln_spec, ln_spec,
                  w_spec, b_spec, w_spec, b_spec, w_spec, b_spec],
        out_specs=(out_spec, out_spec, out_spec),
        scratch_shapes=[pltpu.VMEM((tm, H), x.dtype)],        # cached LN(x)
        compiler_params=pltpu.CompilerParams(
            dimension_semantics=("parallel", "parallel"),
            vmem_limit_bytes=budget),
    )(x, g.reshape(1, H), b.reshape(1, H),
      wq, bq.reshape(1, H), wk, bk.reshape(1, H), wv, bv.reshape(1, H))


def attention(q, k, v, ext_mask, *, head_dim, heads_per_block):
    B, S, H = q.shape
    blk = heads_per_block * head_dim
    nhb = H // blk
    dsz = jnp.dtype(q.dtype).itemsize
    budget = _vmem_budget_bytes()

    # Query-row tiling; K/V stay resident across query tiles for a fixed head
    # group.  Shrink tq if K/V + Q/out tiles + per-head f32 score blocks blow
    # the budget.
    def step_bytes(t):
        return (2 * 2 * S * blk * dsz                         # K, V (dbl-buffered)
                + 2 * 2 * t * blk * dsz                       # Q, out tiles
                + heads_per_block * t * S * 4)                # f32 score blocks
    tq = _shrink_to_fit(_pick_row_tile(S, 256), step_bytes, budget)

    q_spec = pl.BlockSpec((None, tq, blk), lambda b, h, qi: (b, qi, h))
    kv_spec = pl.BlockSpec((None, S, blk), lambda b, h, qi: (b, 0, h))
    mask_spec = pl.BlockSpec((None, 1, S), lambda b, h, qi: (b, 0, 0))
    return pl.pallas_call(
        partial(_attention_kernel, head_dim=head_dim),
        out_shape=jax.ShapeDtypeStruct((B, S, H), q.dtype),
        grid=(B, nhb, S // tq),
        in_specs=[q_spec, kv_spec, kv_spec, mask_spec],
        out_specs=q_spec,
        compiler_params=pltpu.CompilerParams(
            dimension_semantics=("parallel", "parallel", "parallel"),
            vmem_limit_bytes=budget),
    )(q, k, v, ext_mask)


def out_proj_residual(x, w, b, residual):
    M, H = x.shape
    cd = x.dtype
    dsz = jnp.dtype(cd).itemsize
    budget = _vmem_budget_bytes()

    resident = 2 * H * H * dsz <= budget // 2
    tn = H if resident else _pick_col_tile(H)
    fixed = 2 * H * tn * dsz + 2 * tn * 4
    row_bytes = 2 * H * dsz + 2 * 2 * tn * dsz                # x + residual/out tiles
    tm = _shrink_to_fit(_pick_row_tile(M), lambda t: fixed + t * row_bytes, budget)

    return pl.pallas_call(
        _out_proj_kernel,
        out_shape=jax.ShapeDtypeStruct((M, H), x.dtype),
        grid=(M // tm, H // tn),
        in_specs=[pl.BlockSpec((tm, H), lambda i, j: (i, 0)),
                  pl.BlockSpec((H, tn), lambda i, j: (0, j)),
                  pl.BlockSpec((1, tn), lambda i, j: (0, j)),
                  pl.BlockSpec((tm, tn), lambda i, j: (i, j))],
        out_specs=pl.BlockSpec((tm, tn), lambda i, j: (i, j)),
        compiler_params=pltpu.CompilerParams(
            dimension_semantics=("parallel", "parallel"),
            vmem_limit_bytes=budget),
        input_output_aliases={3: 0},              # residual buffer reused for output
    )(x, w, b.reshape(1, H), residual)


def ln_ffn_residual(x, g, b, w1, b1, w2, b2, *, eps):
    M, H = x.shape
    I = w1.shape[1]
    cd = x.dtype
    dsz = jnp.dtype(cd).itemsize
    budget = _vmem_budget_bytes()

    ti = _pick_col_tile(I)
    fixed = 2 * (H * ti + ti * H) * dsz                       # w1/w2 tiles (dbl-buffered)
    row_bytes = (2 * H * dsz                                  # x tile
                 + 2 * H * dsz                                # out tile
                 + H * dsz                                    # LN scratch
                 + H * 4)                                     # f32 accumulator
    tm = _shrink_to_fit(_pick_row_tile(M), lambda t: fixed + t * row_bytes, budget)

    return pl.pallas_call(
        partial(_ln_ffn_kernel, eps=eps),
        out_shape=jax.ShapeDtypeStruct((M, H), x.dtype),
        grid=(M // tm, I // ti),
        in_specs=[pl.BlockSpec((tm, H), lambda i, j: (i, 0)),
                  pl.BlockSpec((1, H), lambda i, j: (0, 0)),
                  pl.BlockSpec((1, H), lambda i, j: (0, 0)),
                  pl.BlockSpec((H, ti), lambda i, j: (0, j)),
                  pl.BlockSpec((1, ti), lambda i, j: (0, j)),
                  pl.BlockSpec((ti, H), lambda i, j: (j, 0)),
                  pl.BlockSpec((1, H), lambda i, j: (0, 0))],
        out_specs=pl.BlockSpec((tm, H), lambda i, j: (i, 0)),
        scratch_shapes=[pltpu.VMEM((tm, H), x.dtype),         # LN(x) cached across I tiles
                        pltpu.VMEM((tm, H), jnp.float32)],    # f32 accumulator
        compiler_params=pltpu.CompilerParams(
            dimension_semantics=("parallel", "arbitrary"),
            vmem_limit_bytes=budget),
        input_output_aliases={0: 0},              # x buffer reused for output
    )(x, g.reshape(1, H), b.reshape(1, H), w1, b1.reshape(1, I), w2, b2.reshape(1, H))


def layer_norm(x, gamma, beta, eps):
    M, H = x.shape
    tm = _pick_row_tile(M)
    return pl.pallas_call(
        partial(_layernorm_kernel, eps=eps),
        out_shape=jax.ShapeDtypeStruct((M, H), x.dtype),
        grid=(M // tm,),
        in_specs=[pl.BlockSpec((tm, H), lambda i: (i, 0)),
                  pl.BlockSpec((1, H), lambda i: (0, 0)),
                  pl.BlockSpec((1, H), lambda i: (0, 0))],
        out_specs=pl.BlockSpec((tm, H), lambda i: (i, 0)),
        compiler_params=pltpu.CompilerParams(dimension_semantics=("parallel",)),
    )(x, gamma.reshape(1, H), beta.reshape(1, H))


# ----------------------------- encoder forward ------------------------------ #

def cast_params(layers, compute_dtype):
    """One-time (load-time) cast of matmul weights to the compute dtype.
    Biases and LayerNorm parameters stay f32 (added in f32)."""
    cd = compute_dtype
    out = []
    for p in layers:
        out.append(dict(
            ln1_g=p["ln1_g"], ln1_b=p["ln1_b"],
            q=(p["q"][0].astype(cd), p["q"][1]),
            k=(p["k"][0].astype(cd), p["k"][1]),
            v=(p["v"][0].astype(cd), p["v"][1]),
            o=(p["o"][0].astype(cd), p["o"][1]),
            ln2_g=p["ln2_g"], ln2_b=p["ln2_b"],
            ffn1=(p["ffn1"][0].astype(cd), p["ffn1"][1]),
            ffn2=(p["ffn2"][0].astype(cd), p["ffn2"][1]),
        ))
    return out


def encoder_forward(hidden_states, attention_mask, layers, final_ln, *,
                    num_heads, eps):
    B, S, H = hidden_states.shape
    d = H // num_heads
    q_scale = 1.0 / math.sqrt(d)
    hpb = _heads_per_block(num_heads, d)
    # HF-style additive mask, kept in f32: 0 keep / -10000 pad
    ext_mask = ((1.0 - attention_mask.astype(jnp.float32)) * -10000.0).reshape(B, 1, S)

    cd = layers[0]["q"][0].dtype                # compute dtype = weight dtype
    x2 = hidden_states.astype(cd).reshape(B * S, H)
    for p in layers:
        wq, bq = p["q"]; wk, bk = p["k"]; wv, bv = p["v"]
        q, k, v = ln_qkv_proj(x2, p["ln1_g"], p["ln1_b"],
                              wq, bq, wk, bk, wv, bv, eps=eps, q_scale=q_scale)
        ctx = attention(q.reshape(B, S, H), k.reshape(B, S, H),
                        v.reshape(B, S, H), ext_mask,
                        head_dim=d, heads_per_block=hpb)
        wo, bo = p["o"]
        x2 = out_proj_residual(ctx.reshape(B * S, H), wo, bo, x2)
        w1, b1 = p["ffn1"]; w2, b2 = p["ffn2"]
        x2 = ln_ffn_residual(x2, p["ln2_g"], p["ln2_b"], w1, b1, w2, b2, eps=eps)
    x2 = layer_norm(x2, final_ln["g"], final_ln["b"], eps)
    return x2.reshape(B, S, H)


# ---------------------------- pure-JAX reference ----------------------------- #

def _ref_ln(x, g, b, eps):
    m = jnp.mean(x, -1, keepdims=True)
    v = jnp.mean((x - m) ** 2, -1, keepdims=True)
    return (x - m) * jax.lax.rsqrt(v + eps) * g + b


def encoder_reference(hidden_states, attention_mask, layers, final_ln, *,
                      num_heads, eps):
    B, S, H = hidden_states.shape
    d = H // num_heads
    scale = 1.0 / math.sqrt(d)
    ext_mask = (1.0 - attention_mask[:, None, None, :].astype(jnp.float32)) * -10000.0
    x = hidden_states
    for p in layers:
        h = _ref_ln(x, p["ln1_g"], p["ln1_b"], eps)
        q = (h @ p["q"][0] + p["q"][1]).reshape(B, S, num_heads, d).transpose(0, 2, 1, 3)
        k = (h @ p["k"][0] + p["k"][1]).reshape(B, S, num_heads, d).transpose(0, 2, 1, 3)
        v = (h @ p["v"][0] + p["v"][1]).reshape(B, S, num_heads, d).transpose(0, 2, 1, 3)
        s = jnp.einsum("bhqd,bhkd->bhqk", q, k) * scale + ext_mask
        pr = jax.nn.softmax(s, axis=-1)
        ctx = jnp.einsum("bhqk,bhkd->bhqd", pr, v).transpose(0, 2, 1, 3).reshape(B, S, H)
        x = x + (ctx @ p["o"][0] + p["o"][1])
        h = _ref_ln(x, p["ln2_g"], p["ln2_b"], eps)
        h1 = _gelu_tanh(h @ p["ffn1"][0] + p["ffn1"][1])
        x = x + (h1 @ p["ffn2"][0] + p["ffn2"][1])
    return _ref_ln(x, final_ln["g"], final_ln["b"], eps)


# ------------------------------- param init ---------------------------------- #

def init_params(key, num_layers, H, I):
    def dense(k, fan_in, fan_out):
        w = jax.random.normal(k, (fan_in, fan_out), jnp.float32) * 0.02
        b = jnp.zeros((fan_out,), jnp.float32)
        return (w, b)

    layers = []
    keys = jax.random.split(key, num_layers)
    for l in range(num_layers):
        ks = jax.random.split(keys[l], 6)
        layers.append(dict(
            ln1_g=jnp.ones((H,), jnp.float32), ln1_b=jnp.zeros((H,), jnp.float32),
            q=dense(ks[0], H, H), k=dense(ks[1], H, H), v=dense(ks[2], H, H),
            o=dense(ks[3], H, H),
            ln2_g=jnp.ones((H,), jnp.float32), ln2_b=jnp.zeros((H,), jnp.float32),
            ffn1=dense(ks[4], H, I), ffn2=dense(ks[5], I, H),
        ))
    final_ln = dict(g=jnp.ones((H,), jnp.float32), b=jnp.zeros((H,), jnp.float32))
    return layers, final_ln


# ---------------------------------- main -------------------------------------- #

if __name__ == "__main__":
    # small config consistent with the module: num_hidden_layers=2,
    # hidden_size=32, num_attention_heads=4, intermediate_size=64, eps=1e-5
    B, S, H, NH, I, L = 2, 8, 32, 4, 64, 2
    EPS = 1e-5

    root = jax.random.PRNGKey(0)
    k_x, k_p = jax.random.split(root)
    hidden_states = jax.random.normal(k_x, (B, S, H), jnp.float32)
    # attention_mask: 1 = attend, 0 = padding (last two tokens of batch 1 padded)
    attention_mask = jnp.ones((B, S), jnp.float32).at[1, -2:].set(0.0)

    layers, final_ln = init_params(k_p, L, H, I)

    ref = encoder_reference(hidden_states, attention_mask, layers, final_ln,
                            num_heads=NH, eps=EPS)

    fwd = jax.jit(partial(encoder_forward, num_heads=NH, eps=EPS))

    # f32 path: correctness check against the pure-JAX reference.
    layers_f32 = cast_params(layers, jnp.float32)
    out = jax.block_until_ready(fwd(hidden_states, attention_mask, layers_f32, final_ln))
    assert out.shape == (B, S, H)
    assert jnp.allclose(out, ref, rtol=1e-2, atol=1e-2), "f32 kernel mismatch vs reference"

    # bf16 operands / f32 accumulation: production fast path; weights pre-cast
    # once at load time (no per-forward convert ops).
    layers_bf16 = cast_params(layers, jnp.bfloat16)
    out_bf16 = jax.block_until_ready(
        fwd(hidden_states, attention_mask, layers_bf16, final_ln))
    out_bf16 = out_bf16.astype(jnp.float32)
    assert out_bf16.shape == (B, S, H)
    assert bool(jnp.all(jnp.isfinite(out_bf16)))
    assert jnp.allclose(out_bf16, ref, rtol=1e-1, atol=1e-1), \
        "bf16 kernel mismatch vs reference"

    print("KERNEL_OK")
</pallas_src>

<mosaic_0001>
module attributes {stable_mosaic.version = 11 : i64} {
  func.func @_attention_kernel(%arg0: i32, %arg1: i32, %arg2: i32, %arg3: memref<1x8x32xf32, #tpu.memory_space<vmem>>, %arg4: memref<1x8x32xf32, #tpu.memory_space<vmem>>, %arg5: memref<1x8x32xf32, #tpu.memory_space<vmem>>, %arg6: memref<1x1x8xf32, #tpu.memory_space<vmem>>, %arg7: memref<1x8x32xf32, #tpu.memory_space<vmem>>) attributes {dimension_semantics = [#tpu.dimension_semantics<parallel>, #tpu.dimension_semantics<parallel>, #tpu.dimension_semantics<parallel>], iteration_bounds = array<i64: 2, 1, 1>, scalar_prefetch = 0 : i64, scratch_operands = 0 : i64, tpu.core_type = #tpu.core_type<tc>, window_params = [{transform_indices = @transform_0, window_bounds = array<i64: 1, 8, 32>}, {transform_indices = @transform_1, window_bounds = array<i64: 1, 8, 32>}, {transform_indices = @transform_2, window_bounds = array<i64: 1, 8, 32>}, {transform_indices = @transform_3, window_bounds = array<i64: 1, 1, 8>}, {transform_indices = @transform_4, window_bounds = array<i64: 1, 8, 32>}]} {
    %c0 = arith.constant 0 : index
    %c0_0 = arith.constant 0 : index
    %c0_1 = arith.constant 0 : index
    %0 = vector.load %arg6[%c0, %c0_0, %c0_1] : memref<1x1x8xf32, #tpu.memory_space<vmem>>, vector<1x1x8xf32>
    %1 = vector.shape_cast %0 : vector<1x1x8xf32> to vector<1x8xf32>
    %c0_2 = arith.constant 0 : index
    %c0_3 = arith.constant 0 : index
    %c0_4 = arith.constant 0 : index
    %2 = vector.load %arg3[%c0_2, %c0_3, %c0_4] : memref<1x8x32xf32, #tpu.memory_space<vmem>>, vector<1x8x32xf32>
    %3 = vector.shape_cast %2 : vector<1x8x32xf32> to vector<8x32xf32>
    %c0_5 = arith.constant 0 : index
    %c0_6 = arith.constant 0 : index
    %c0_7 = arith.constant 0 : index
    %4 = vector.load %arg4[%c0_5, %c0_6, %c0_7] : memref<1x8x32xf32, #tpu.memory_space<vmem>>, vector<1x8x32xf32>
    %5 = vector.shape_cast %4 : vector<1x8x32xf32> to vector<8x32xf32>
    %c0_8 = arith.constant 0 : index
    %c0_9 = arith.constant 0 : index
    %c0_10 = arith.constant 0 : index
    %6 = vector.load %arg5[%c0_8, %c0_9, %c0_10] : memref<1x8x32xf32, #tpu.memory_space<vmem>>, vector<1x8x32xf32>
    %7 = vector.shape_cast %6 : vector<1x8x32xf32> to vector<8x32xf32>
    %8 = vector.extract_strided_slice %3 {offsets = [0, 0], sizes = [8, 8], strides = [1, 1]} : vector<8x32xf32> to vector<8x8xf32>
    %9 = vector.extract_strided_slice %5 {offsets = [0, 0], sizes = [8, 8], strides = [1, 1]} : vector<8x32xf32> to vector<8x8xf32>
    %10 = vector.extract_strided_slice %7 {offsets = [0, 0], sizes = [8, 8], strides = [1, 1]} : vector<8x32xf32> to vector<8x8xf32>
    %cst = arith.constant dense<0.000000e+00> : vector<8x8xf32>
    %11 = tpu.matmul %8, %9, %cst {dimension_numbers = #tpu.dot_dimension_numbers<[1], [1], [0], [0], [0, 0, 1, 0], [], []>} : vector<8x8xf32>, vector<8x8xf32>, vector<8x8xf32> -> vector<8x8xf32>
    %12 = vector.broadcast %1 : vector<1x8xf32> to vector<8x8xf32>
    %13 = arith.addf %11, %12 : vector<8x8xf32>
    %cst_11 = arith.constant dense<0xFF800000> : vector<8xf32>
    %14 = vector.multi_reduction <maximumf>, %13, %cst_11 [1] : vector<8x8xf32> to vector<8xf32>
    %15 = vector.shape_cast %14 : vector<8xf32> to vector<8x1xf32>
    %16 = vector.broadcast %15 : vector<8x1xf32> to vector<8x8xf32>
    %17 = arith.subf %13, %16 : vector<8x8xf32>
    %18 = math.exp %17 : vector<8x8xf32>
    %cst_12 = arith.constant dense<0.000000e+00> : vector<8xf32>
    %19 = vector.multi_reduction <add>, %18, %cst_12 [1] : vector<8x8xf32> to vector<8xf32>
    %20 = vector.shape_cast %19 : vector<8xf32> to vector<8x1xf32>
    %21 = vector.broadcast %20 : vector<8x1xf32> to vector<8x8xf32>
    %22 = arith.divf %18, %21 : vector<8x8xf32>
    %cst_13 = arith.constant dense<0.000000e+00> : vector<8x8xf32>
    %23 = tpu.matmul %22, %10, %cst_13 {dimension_numbers = #tpu.dot_dimension_numbers<[1], [0], [0], [1], [0, 0, 1, 1], [], []>} : vector<8x8xf32>, vector<8x8xf32>, vector<8x8xf32> -> vector<8x8xf32>
    %24 = vector.extract_strided_slice %3 {offsets = [0, 8], sizes = [8, 8], strides = [1, 1]} : vector<8x32xf32> to vector<8x8xf32>
    %25 = vector.extract_strided_slice %5 {offsets = [0, 8], sizes = [8, 8], strides = [1, 1]} : vector<8x32xf32> to vector<8x8xf32>
    %26 = vector.extract_strided_slice %7 {offsets = [0, 8], sizes = [8, 8], strides = [1, 1]} : vector<8x32xf32> to vector<8x8xf32>
    %cst_14 = arith.constant dense<0.000000e+00> : vector<8x8xf32>
    %27 = tpu.matmul %24, %25, %cst_14 {dimension_numbers = #tpu.dot_dimension_numbers<[1], [1], [0], [0], [0, 0, 1, 0], [], []>} : vector<8x8xf32>, vector<8x8xf32>, vector<8x8xf32> -> vector<8x8xf32>
    %28 = vector.broadcast %1 : vector<1x8xf32> to vector<8x8xf32>
    %29 = arith.addf %27, %28 : vector<8x8xf32>
    %cst_15 = arith.constant dense<0xFF800000> : vector<8xf32>
    %30 = vector.multi_reduction <maximumf>, %29, %cst_15 [1] : vector<8x8xf32> to vector<8xf32>
    %31 = vector.shape_cast %30 : vector<8xf32> to vector<8x1xf32>
    %32 = vector.broadcast %31 : vector<8x1xf32> to vector<8x8xf32>
    %33 = arith.subf %29, %32 : vector<8x8xf32>
    %34 = math.exp %33 : vector<8x8xf32>
    %cst_16 = arith.constant dense<0.000000e+00> : vector<8xf32>
    %35 = vector.multi_reduction <add>, %34, %cst_16 [1] : vector<8x8xf32> to vector<8xf32>
    %36 = vector.shape_cast %35 : vector<8xf32> to vector<8x1xf32>
    %37 = vector.broadcast %36 : vector<8x1xf32> to vector<8x8xf32>
    %38 = arith.divf %34, %37 : vector<8x8xf32>
    %cst_17 = arith.constant dense<0.000000e+00> : vector<8x8xf32>
    %39 = tpu.matmul %38, %26, %cst_17 {dimension_numbers = #tpu.dot_dimension_numbers<[1], [0], [0], [1], [0, 0, 1, 1], [], []>} : vector<8x8xf32>, vector<8x8xf32>, vector<8x8xf32> -> vector<8x8xf32>
    %40 = vector.extract_strided_slice %3 {offsets = [0, 16], sizes = [8, 8], strides = [1, 1]} : vector<8x32xf32> to vector<8x8xf32>
    %41 = vector.extract_strided_slice %5 {offsets = [0, 16], sizes = [8, 8], strides = [1, 1]} : vector<8x32xf32> to vector<8x8xf32>
    %42 = vector.extract_strided_slice %7 {offsets = [0, 16], sizes = [8, 8], strides = [1, 1]} : vector<8x32xf32> to vector<8x8xf32>
    %cst_18 = arith.constant dense<0.000000e+00> : vector<8x8xf32>
    %43 = tpu.matmul %40, %41, %cst_18 {dimension_numbers = #tpu.dot_dimension_numbers<[1], [1], [0], [0], [0, 0, 1, 0], [], []>} : vector<8x8xf32>, vector<8x8xf32>, vector<8x8xf32> -> vector<8x8xf32>
    %44 = vector.broadcast %1 : vector<1x8xf32> to vector<8x8xf32>
    %45 = arith.addf %43, %44 : vector<8x8xf32>
    %cst_19 = arith.constant dense<0xFF800000> : vector<8xf32>
    %46 = vector.multi_reduction <maximumf>, %45, %cst_19 [1] : vector<8x8xf32> to vector<8xf32>
    %47 = vector.shape_cast %46 : vector<8xf32> to vector<8x1xf32>
    %48 = vector.broadcast %47 : vector<8x1xf32> to vector<8x8xf32>
    %49 = arith.subf %45, %48 : vector<8x8xf32>
    %50 = math.exp %49 : vector<8x8xf32>
    %cst_20 = arith.constant dense<0.000000e+00> : vector<8xf32>
    %51 = vector.multi_reduction <add>, %50, %cst_20 [1] : vector<8x8xf32> to vector<8xf32>
    %52 = vector.shape_cast %51 : vector<8xf32> to vector<8x1xf32>
    %53 = vector.broadcast %52 : vector<8x1xf32> to vector<8x8xf32>
    %54 = arith.divf %50, %53 : vector<8x8xf32>
    %cst_21 = arith.constant dense<0.000000e+00> : vector<8x8xf32>
    %55 = tpu.matmul %54, %42, %cst_21 {dimension_numbers = #tpu.dot_dimension_numbers<[1], [0], [0], [1], [0, 0, 1, 1], [], []>} : vector<8x8xf32>, vector<8x8xf32>, vector<8x8xf32> -> vector<8x8xf32>
    %56 = vector.extract_strided_slice %3 {offsets = [0, 24], sizes = [8, 8], strides = [1, 1]} : vector<8x32xf32> to vector<8x8xf32>
    %57 = vector.extract_strided_slice %5 {offsets = [0, 24], sizes = [8, 8], strides = [1, 1]} : vector<8x32xf32> to vector<8x8xf32>
    %58 = vector.extract_strided_slice %7 {offsets = [0, 24], sizes = [8, 8], strides = [1, 1]} : vector<8x32xf32> to vector<8x8xf32>
    %cst_22 = arith.constant dense<0.000000e+00> : vector<8x8xf32>
    %59 = tpu.matmul %56, %57, %cst_22 {dimension_numbers = #tpu.dot_dimension_numbers<[1], [1], [0], [0], [0, 0, 1, 0], [], []>} : vector<8x8xf32>, vector<8x8xf32>, vector<8x8xf32> -> vector<8x8xf32>
    %60 = vector.broadcast %1 : vector<1x8xf32> to vector<8x8xf32>
    %61 = arith.addf %59, %60 : vector<8x8xf32>
    %cst_23 = arith.constant dense<0xFF800000> : vector<8xf32>
    %62 = vector.multi_reduction <maximumf>, %61, %cst_23 [1] : vector<8x8xf32> to vector<8xf32>
    %63 = vector.shape_cast %62 : vector<8xf32> to vector<8x1xf32>
    %64 = vector.broadcast %63 : vector<8x1xf32> to vector<8x8xf32>
    %65 = arith.subf %61, %64 : vector<8x8xf32>
    %66 = math.exp %65 : vector<8x8xf32>
    %cst_24 = arith.constant dense<0.000000e+00> : vector<8xf32>
    %67 = vector.multi_reduction <add>, %66, %cst_24 [1] : vector<8x8xf32> to vector<8xf32>
    %68 = vector.shape_cast %67 : vector<8xf32> to vector<8x1xf32>
    %69 = vector.broadcast %68 : vector<8x1xf32> to vector<8x8xf32>
    %70 = arith.divf %66, %69 : vector<8x8xf32>
    %cst_25 = arith.constant dense<0.000000e+00> : vector<8x8xf32>
    %71 = tpu.matmul %70, %58, %cst_25 {dimension_numbers = #tpu.dot_dimension_numbers<[1], [0], [0], [1], [0, 0, 1, 1], [], []>} : vector<8x8xf32>, vector<8x8xf32>, vector<8x8xf32> -> vector<8x8xf32>
    %72 = tpu.concatenate %23, %39, %55, %71 in 1 : vector<8x8xf32>, vector<8x8xf32>, vector<8x8xf32>, vector<8x8xf32> -> vector<8x32xf32>
    %c0_26 = arith.constant 0 : index
    %c0_27 = arith.constant 0 : index
    %c0_28 = arith.constant 0 : index
    %73 = vector.load %arg7[%c0_26, %c0_27, %c0_28] : memref<1x8x32xf32, #tpu.memory_space<vmem>>, vector<1x8x32xf32>
    %74 = vector.shape_cast %73 : vector<1x8x32xf32> to vector<8x32xf32>
    %75 = vector.shape_cast %72 : vector<8x32xf32> to vector<1x8x32xf32>
    tpu.vector_store %arg7[%c0_26, %c0_27, %c0_28], %75 {strides = array<i32>} : memref<1x8x32xf32, #tpu.memory_space<vmem>>, vector<1x8x32xf32>,
    return
  }
  func.func @transform_0(%arg0: i32, %arg1: i32, %arg2: i32) -> (i32, i32, i32) {
    %c0_i32 = arith.constant 0 : i32
    return %arg0, %arg2, %arg1 : i32, i32, i32
  }
  func.func @transform_1(%arg0: i32, %arg1: i32, %arg2: i32) -> (i32, i32, i32) {
    %c0_i32 = arith.constant 0 : i32
    %c0_i32_0 = arith.constant 0 : i32
    return %arg0, %c0_i32, %arg1 : i32, i32, i32
  }
  func.func @transform_2(%arg0: i32, %arg1: i32, %arg2: i32) -> (i32, i32, i32) {
    %c0_i32 = arith.constant 0 : i32
    %c0_i32_0 = arith.constant 0 : i32
    return %arg0, %c0_i32, %arg1 : i32, i32, i32
  }
  func.func @transform_3(%arg0: i32, %arg1: i32, %arg2: i32) -> (i32, i32, i32) {
    %c0_i32 = arith.constant 0 : i32
    %c0_i32_0 = arith.constant 0 : i32
    %c0_i32_1 = arith.constant 0 : i32
    return %arg0, %c0_i32, %c0_i32_0 : i32, i32, i32
  }
  func.func @transform_4(%arg0: i32, %arg1: i32, %arg2: i32) -> (i32, i32, i32) {
    %c0_i32 = arith.constant 0 : i32
    return %arg0, %arg2, %arg1 : i32, i32, i32
  }
}

module attributes {stable_mosaic.version = 11 : i64} {
  func.func @_ln_qkv_kernel(%arg0: i32, %arg1: i32, %arg2: memref<16x32xf32, #tpu.memory_space<vmem>>, %arg3: memref<1x32xf32, #tpu.memory_space<vmem>>, %arg4: memref<1x32xf32, #tpu.memory_space<vmem>>, %arg5: memref<32x32xf32, #tpu.memory_space<vmem>>, %arg6: memref<1x32xf32, #tpu.memory_space<vmem>>, %arg7: memref<32x32xf32, #tpu.memory_space<vmem>>, %arg8: memref<1x32xf32, #tpu.memory_space<vmem>>, %arg9: memref<32x32xf32, #tpu.memory_space<vmem>>, %arg10: memref<1x32xf32, #tpu.memory_space<vmem>>, %arg11: memref<16x32xf32, #tpu.memory_space<vmem>>, %arg12: memref<16x32xf32, #tpu.memory_space<vmem>>, %arg13: memref<16x32xf32, #tpu.memory_space<vmem>>, %arg14: memref<16x32xf32, #tpu.memory_space<vmem>>) attributes {dimension_semantics = [#tpu.dimension_semantics<parallel>, #tpu.dimension_semantics<parallel>], iteration_bounds = array<i64: 1, 1>, scalar_prefetch = 0 : i64, scratch_operands = 1 : i64, tpu.core_type = #tpu.core_type<tc>, window_params = [{transform_indices = @transform_0, window_bounds = array<i64: 16, 32>}, {pipeline_mode = #tpu.pipeline_mode<synchronous>, transform_indices = @transform_1, window_bounds = array<i64: 1, 32>}, {pipeline_mode = #tpu.pipeline_mode<synchronous>, transform_indices = @transform_2, window_bounds = array<i64: 1, 32>}, {transform_indices = @transform_3, window_bounds = array<i64: 32, 32>}, {transform_indices = @transform_4, window_bounds = array<i64: 1, 32>}, {transform_indices = @transform_5, window_bounds = array<i64: 32, 32>}, {transform_indices = @transform_6, window_bounds = array<i64: 1, 32>}, {transform_indices = @transform_7, window_bounds = array<i64: 32, 32>}, {transform_indices = @transform_8, window_bounds = array<i64: 1, 32>}, {transform_indices = @transform_9, window_bounds = array<i64: 16, 32>}, {transform_indices = @transform_10, window_bounds = array<i64: 16, 32>}, {transform_indices = @transform_11, window_bounds = array<i64: 16, 32>}]} {
    %c0_i32 = arith.constant 0 : i32
    %0 = arith.cmpi eq, %arg1, %c0_i32 : i32
    %1 = arith.extui %0 : i1 to i32
    %c0_i32_0 = arith.constant 0 : i32
    %2 = arith.cmpi ne, %1, %c0_i32_0 : i32
    scf.if %2 {
      %c0_23 = arith.constant 0 : index
      %c0_24 = arith.constant 0 : index
      %24 = vector.load %arg2[%c0_23, %c0_24] : memref<16x32xf32, #tpu.memory_space<vmem>>, vector<16x32xf32>
      %c0_25 = arith.constant 0 : index
      %c0_26 = arith.constant 0 : index
      %25 = vector.load %arg3[%c0_25, %c0_26] : memref<1x32xf32, #tpu.memory_space<vmem>>, vector<1x32xf32>
      %c0_27 = arith.constant 0 : index
      %c0_28 = arith.constant 0 : index
      %26 = vector.load %arg4[%c0_27, %c0_28] : memref<1x32xf32, #tpu.memory_space<vmem>>, vector<1x32xf32>
      %cst_29 = arith.constant dense<0.000000e+00> : vector<16xf32>
      %27 = vector.multi_reduction <add>, %24, %cst_29 [1] : vector<16x32xf32> to vector<16xf32>
      %28 = vector.shape_cast %27 : vector<16xf32> to vector<16x1xf32>
      %cst_30 = arith.constant 3.200000e+01 : f32
      %29 = vector.broadcast %cst_30 : f32 to vector<16x1xf32>
      %30 = arith.divf %28, %29 : vector<16x1xf32>
      %31 = vector.broadcast %30 : vector<16x1xf32> to vector<16x32xf32>
      %32 = arith.subf %24, %31 : vector<16x32xf32>
      %33 = arith.mulf %32, %32 : vector<16x32xf32>
      %cst_31 = arith.constant dense<0.000000e+00> : vector<16xf32>
      %34 = vector.multi_reduction <add>, %33, %cst_31 [1] : vector<16x32xf32> to vector<16xf32>
      %35 = vector.shape_cast %34 : vector<16xf32> to vector<16x1xf32>
      %cst_32 = arith.constant 3.200000e+01 : f32
      %36 = vector.broadcast %cst_32 : f32 to vector<16x1xf32>
      %37 = arith.divf %35, %36 : vector<16x1xf32>
      %38 = vector.broadcast %30 : vector<16x1xf32> to vector<16x32xf32>
      %39 = arith.subf %24, %38 : vector<16x32xf32>
      %cst_33 = arith.constant 9.99999974E-6 : f32
      %40 = vector.broadcast %cst_33 : f32 to vector<16x1xf32>
      %41 = arith.addf %37, %40 : vector<16x1xf32>
      %42 = math.rsqrt %41 : vector<16x1xf32>
      %43 = vector.broadcast %42 : vector<16x1xf32> to vector<16x32xf32>
      %44 = arith.mulf %39, %43 : vector<16x32xf32>
      %45 = vector.broadcast %25 : vector<1x32xf32> to vector<16x32xf32>
      %46 = arith.mulf %44, %45 : vector<16x32xf32>
      %47 = vector.broadcast %26 : vector<1x32xf32> to vector<16x32xf32>
      %48 = arith.addf %46, %47 : vector<16x32xf32>
      %c0_34 = arith.constant 0 : index
      %c0_35 = arith.constant 0 : index
      %49 = vector.load %arg14[%c0_34, %c0_35] : memref<16x32xf32, #tpu.memory_space<vmem>>, vector<16x32xf32>
      tpu.vector_store %arg14[%c0_34, %c0_35], %48 {strides = array<i32>} : memref<16x32xf32, #tpu.memory_space<vmem>>, vector<16x32xf32>,
    } else {
    }
    %c0 = arith.constant 0 : index
    %c0_1 = arith.constant 0 : index
    %3 = vector.load %arg14[%c0, %c0_1] : memref<16x32xf32, #tpu.memory_space<vmem>>, vector<16x32xf32>
    %c0_2 = arith.constant 0 : index
    %c0_3 = arith.constant 0 : index
    %4 = vector.load %arg5[%c0_2, %c0_3] : memref<32x32xf32, #tpu.memory_space<vmem>>, vector<32x32xf32>
    %cst = arith.constant dense<0.000000e+00> : vector<16x32xf32>
    %5 = tpu.matmul %3, %4, %cst {dimension_numbers = #tpu.dot_dimension_numbers<[1], [0], [0], [1], [0, 0, 1, 1], [], []>} : vector<16x32xf32>, vector<32x32xf32>, vector<16x32xf32> -> vector<16x32xf32>
    %c0_4 = arith.constant 0 : index
    %c0_5 = arith.constant 0 : index
    %6 = vector.load %arg6[%c0_4, %c0_5] : memref<1x32xf32, #tpu.memory_space<vmem>>, vector<1x32xf32>
    %7 = vector.broadcast %6 : vector<1x32xf32> to vector<16x32xf32>
    %8 = arith.addf %5, %7 : vector<16x32xf32>
    %cst_6 = arith.constant 0.353553385 : f32
    %9 = vector.broadcast %cst_6 : f32 to vector<16x32xf32>
    %10 = arith.mulf %8, %9 : vector<16x32xf32>
    %c0_7 = arith.constant 0 : index
    %c0_8 = arith.constant 0 : index
    %11 = vector.load %arg11[%c0_7, %c0_8] : memref<16x32xf32, #tpu.memory_space<vmem>>, vector<16x32xf32>
    tpu.vector_store %arg11[%c0_7, %c0_8], %10 {strides = array<i32>} : memref<16x32xf32, #tpu.memory_space<vmem>>, vector<16x32xf32>,
    %c0_9 = arith.constant 0 : index
    %c0_10 = arith.constant 0 : index
    %12 = vector.load %arg7[%c0_9, %c0_10] : memref<32x32xf32, #tpu.memory_space<vmem>>, vector<32x32xf32>
    %cst_11 = arith.constant dense<0.000000e+00> : vector<16x32xf32>
    %13 = tpu.matmul %3, %12, %cst_11 {dimension_numbers = #tpu.dot_dimension_numbers<[1], [0], [0], [1], [0, 0, 1, 1], [], []>} : vector<16x32xf32>, vector<32x32xf32>, vector<16x32xf32> -> vector<16x32xf32>
    %c0_12 = arith.constant 0 : index
    %c0_13 = arith.constant 0 : index
    %14 = vector.load %arg8[%c0_12, %c0_13] : memref<1x32xf32, #tpu.memory_space<vmem>>, vector<1x32xf32>
    %15 = vector.broadcast %14 : vector<1x32xf32> to vector<16x32xf32>
    %16 = arith.addf %13, %15 : vector<16x32xf32>
    %c0_14 = arith.constant 0 : index
    %c0_15 = arith.constant 0 : index
    %17 = vector.load %arg12[%c0_14, %c0_15] : memref<16x32xf32, #tpu.memory_space<vmem>>, vector<16x32xf32>
    tpu.vector_store %arg12[%c0_14, %c0_15], %16 {strides = array<i32>} : memref<16x32xf32, #tpu.memory_space<vmem>>, vector<16x32xf32>,
    %c0_16 = arith.constant 0 : index
    %c0_17 = arith.constant 0 : index
    %18 = vector.load %arg9[%c0_16, %c0_17] : memref<32x32xf32, #tpu.memory_space<vmem>>, vector<32x32xf32>
    %cst_18 = arith.constant dense<0.000000e+00> : vector<16x32xf32>
    %19 = tpu.matmul %3, %18, %cst_18 {dimension_numbers = #tpu.dot_dimension_numbers<[1], [0], [0], [1], [0, 0, 1, 1], [], []>} : vector<16x32xf32>, vector<32x32xf32>, vector<16x32xf32> -> vector<16x32xf32>
    %c0_19 = arith.constant 0 : index
    %c0_20 = arith.constant 0 : index
    %20 = vector.load %arg10[%c0_19, %c0_20] : memref<1x32xf32, #tpu.memory_space<vmem>>, vector<1x32xf32>
    %21 = vector.broadcast %20 : vector<1x32xf32> to vector<16x32xf32>
    %22 = arith.addf %19, %21 : vector<16x32xf32>
    %c0_21 = arith.constant 0 : index
    %c0_22 = arith.constant 0 : index
    %23 = vector.load %arg13[%c0_21, %c0_22] : memref<16x32xf32, #tpu.memory_space<vmem>>, vector<16x32xf32>
    tpu.vector_store %arg13[%c0_21, %c0_22], %22 {strides = array<i32>} : memref<16x32xf32, #tpu.memory_space<vmem>>, vector<16x32xf32>,
    return
  }
  func.func @transform_0(%arg0: i32, %arg1: i32) -> (i32, i32) {
    %c0_i32 = arith.constant 0 : i32
    %c0_i32_0 = arith.constant 0 : i32
    return %arg0, %c0_i32 : i32, i32
  }
  func.func @transform_1(%arg0: i32, %arg1: i32) -> (i32, i32) {
    %c0_i32 = arith.constant 0 : i32
    %c0_i32_0 = arith.constant 0 : i32
    %c0_i32_1 = arith.constant 0 : i32
    return %c0_i32, %c0_i32_0 : i32, i32
  }
  func.func @transform_2(%arg0: i32, %arg1: i32) -> (i32, i32) {
    %c0_i32 = arith.constant 0 : i32
    %c0_i32_0 = arith.constant 0 : i32
    %c0_i32_1 = arith.constant 0 : i32
    return %c0_i32, %c0_i32_0 : i32, i32
  }
  func.func @transform_3(%arg0: i32, %arg1: i32) -> (i32, i32) {
    %c0_i32 = arith.constant 0 : i32
    %c0_i32_0 = arith.constant 0 : i32
    return %c0_i32, %arg1 : i32, i32
  }
  func.func @transform_4(%arg0: i32, %arg1: i32) -> (i32, i32) {
    %c0_i32 = arith.constant 0 : i32
    %c0_i32_0 = arith.constant 0 : i32
    return %c0_i32, %arg1 : i32, i32
  }
  func.func @transform_5(%arg0: i32, %arg1: i32) -> (i32, i32) {
    %c0_i32 = arith.constant 0 : i32
    %c0_i32_0 = arith.constant 0 : i32
    return %c0_i32, %arg1 : i32, i32
  }
  func.func @transform_6(%arg0: i32, %arg1: i32) -> (i32, i32) {
    %c0_i32 = arith.constant 0 : i32
    %c0_i32_0 = arith.constant 0 : i32
    return %c0_i32, %arg1 : i32, i32
  }
  func.func @transform_7(%arg0: i32, %arg1: i32) -> (i32, i32) {
    %c0_i32 = arith.constant 0 : i32
    %c0_i32_0 = arith.constant 0 : i32
    return %c0_i32, %arg1 : i32, i32
  }
  func.func @transform_8(%arg0: i32, %arg1: i32) -> (i32, i32) {
    %c0_i32 = arith.constant 0 : i32
    %c0_i32_0 = arith.constant 0 : i32
    return %c0_i32, %arg1 : i32, i32
  }
  func.func @transform_9(%arg0: i32, %arg1: i32) -> (i32, i32) {
    %c0_i32 = arith.constant 0 : i32
    return %arg0, %arg1 : i32, i32
  }
  func.func @transform_10(%arg0: i32, %arg1: i32) -> (i32, i32) {
    %c0_i32 = arith.constant 0 : i32
    return %arg0, %arg1 : i32, i32
  }
  func.func @transform_11(%arg0: i32, %arg1: i32) -> (i32, i32) {
    %c0_i32 = arith.constant 0 : i32
    return %arg0, %arg1 : i32, i32
  }
}

module attributes {stable_mosaic.version = 11 : i64} {
  func.func @_ln_ffn_kernel(%arg0: i32, %arg1: i32, %arg2: memref<16x32xf32, #tpu.memory_space<vmem>>, %arg3: memref<1x32xf32, #tpu.memory_space<vmem>>, %arg4: memref<1x32xf32, #tpu.memory_space<vmem>>, %arg5: memref<32x64xf32, #tpu.memory_space<vmem>>, %arg6: memref<1x64xf32, #tpu.memory_space<vmem>>, %arg7: memref<64x32xf32, #tpu.memory_space<vmem>>, %arg8: memref<1x32xf32, #tpu.memory_space<vmem>>, %arg9: memref<16x32xf32, #tpu.memory_space<vmem>>, %arg10: memref<16x32xf32, #tpu.memory_space<vmem>>, %arg11: memref<16x32xf32, #tpu.memory_space<vmem>>) attributes {dimension_semantics = [#tpu.dimension_semantics<parallel>, #tpu.dimension_semantics<arbitrary>], iteration_bounds = array<i64: 1, 1>, scalar_prefetch = 0 : i64, scratch_operands = 2 : i64, tpu.core_type = #tpu.core_type<tc>, window_params = [{transform_indices = @transform_0, window_bounds = array<i64: 16, 32>}, {pipeline_mode = #tpu.pipeline_mode<synchronous>, transform_indices = @transform_1, window_bounds = array<i64: 1, 32>}, {pipeline_mode = #tpu.pipeline_mode<synchronous>, transform_indices = @transform_2, window_bounds = array<i64: 1, 32>}, {transform_indices = @transform_3, window_bounds = array<i64: 32, 64>}, {transform_indices = @transform_4, window_bounds = array<i64: 1, 64>}, {transform_indices = @transform_5, window_bounds = array<i64: 64, 32>}, {pipeline_mode = #tpu.pipeline_mode<synchronous>, transform_indices = @transform_6, window_bounds = array<i64: 1, 32>}, {transform_indices = @transform_7, window_bounds = array<i64: 16, 32>}]} {
    %c0_i32 = arith.constant 0 : i32
    %0 = arith.cmpi eq, %arg1, %c0_i32 : i32
    %1 = arith.extui %0 : i1 to i32
    %c0_i32_0 = arith.constant 0 : i32
    %2 = arith.cmpi ne, %1, %c0_i32_0 : i32
    scf.if %2 {
      %c0_19 = arith.constant 0 : index
      %c0_20 = arith.constant 0 : index
      %30 = vector.load %arg2[%c0_19, %c0_20] : memref<16x32xf32, #tpu.memory_space<vmem>>, vector<16x32xf32>
      %c0_21 = arith.constant 0 : index
      %c0_22 = arith.constant 0 : index
      %31 = vector.load %arg3[%c0_21, %c0_22] : memref<1x32xf32, #tpu.memory_space<vmem>>, vector<1x32xf32>
      %c0_23 = arith.constant 0 : index
      %c0_24 = arith.constant 0 : index
      %32 = vector.load %arg4[%c0_23, %c0_24] : memref<1x32xf32, #tpu.memory_space<vmem>>, vector<1x32xf32>
      %cst_25 = arith.constant dense<0.000000e+00> : vector<16xf32>
      %33 = vector.multi_reduction <add>, %30, %cst_25 [1] : vector<16x32xf32> to vector<16xf32>
      %34 = vector.shape_cast %33 : vector<16xf32> to vector<16x1xf32>
      %cst_26 = arith.constant 3.200000e+01 : f32
      %35 = vector.broadcast %cst_26 : f32 to vector<16x1xf32>
      %36 = arith.divf %34, %35 : vector<16x1xf32>
      %37 = vector.broadcast %36 : vector<16x1xf32> to vector<16x32xf32>
      %38 = arith.subf %30, %37 : vector<16x32xf32>
      %39 = arith.mulf %38, %38 : vector<16x32xf32>
      %cst_27 = arith.constant dense<0.000000e+00> : vector<16xf32>
      %40 = vector.multi_reduction <add>, %39, %cst_27 [1] : vector<16x32xf32> to vector<16xf32>
      %41 = vector.shape_cast %40 : vector<16xf32> to vector<16x1xf32>
      %cst_28 = arith.constant 3.200000e+01 : f32
      %42 = vector.broadcast %cst_28 : f32 to vector<16x1xf32>
      %43 = arith.divf %41, %42 : vector<16x1xf32>
      %44 = vector.broadcast %36 : vector<16x1xf32> to vector<16x32xf32>
      %45 = arith.subf %30, %44 : vector<16x32xf32>
      %cst_29 = arith.constant 9.99999974E-6 : f32
      %46 = vector.broadcast %cst_29 : f32 to vector<16x1xf32>
      %47 = arith.addf %43, %46 : vector<16x1xf32>
      %48 = math.rsqrt %47 : vector<16x1xf32>
      %49 = vector.broadcast %48 : vector<16x1xf32> to vector<16x32xf32>
      %50 = arith.mulf %45, %49 : vector<16x32xf32>
      %51 = vector.broadcast %31 : vector<1x32xf32> to vector<16x32xf32>
      %52 = arith.mulf %50, %51 : vector<16x32xf32>
      %53 = vector.broadcast %32 : vector<1x32xf32> to vector<16x32xf32>
      %54 = arith.addf %52, %53 : vector<16x32xf32>
      %c0_30 = arith.constant 0 : index
      %c0_31 = arith.constant 0 : index
      %55 = vector.load %arg10[%c0_30, %c0_31] : memref<16x32xf32, #tpu.memory_space<vmem>>, vector<16x32xf32>
      tpu.vector_store %arg10[%c0_30, %c0_31], %54 {strides = array<i32>} : memref<16x32xf32, #tpu.memory_space<vmem>>, vector<16x32xf32>,
      %cst_32 = arith.constant 0.000000e+00 : f32
      %56 = vector.broadcast %cst_32 : f32 to vector<16x32xf32>
      %c0_33 = arith.constant 0 : index
      %c0_34 = arith.constant 0 : index
      %57 = vector.load %arg11[%c0_33, %c0_34] : memref<16x32xf32, #tpu.memory_space<vmem>>, vector<16x32xf32>
      tpu.vector_store %arg11[%c0_33, %c0_34], %56 {strides = array<i32>} : memref<16x32xf32, #tpu.memory_space<vmem>>, vector<16x32xf32>,
    } else {
    }
    %c0 = arith.constant 0 : index
    %c0_1 = arith.constant 0 : index
    %3 = vector.load %arg10[%c0, %c0_1] : memref<16x32xf32, #tpu.memory_space<vmem>>, vector<16x32xf32>
    %c0_2 = arith.constant 0 : index
    %c0_3 = arith.constant 0 : index
    %4 = vector.load %arg5[%c0_2, %c0_3] : memref<32x64xf32, #tpu.memory_space<vmem>>, vector<32x64xf32>
    %cst = arith.constant dense<0.000000e+00> : vector<16x64xf32>
    %5 = tpu.matmul %3, %4, %cst {dimension_numbers = #tpu.dot_dimension_numbers<[1], [0], [0], [1], [0, 0, 1, 1], [], []>} : vector<16x32xf32>, vector<32x64xf32>, vector<16x64xf32> -> vector<16x64xf32>
    %c0_4 = arith.constant 0 : index
    %c0_5 = arith.constant 0 : index
    %6 = vector.load %arg6[%c0_4, %c0_5] : memref<1x64xf32, #tpu.memory_space<vmem>>, vector<1x64xf32>
    %7 = vector.broadcast %6 : vector<1x64xf32> to vector<16x64xf32>
    %8 = arith.addf %5, %7 : vector<16x64xf32>
    %cst_6 = arith.constant 5.000000e-01 : f32
    %9 = vector.broadcast %cst_6 : f32 to vector<16x64xf32>
    %10 = arith.mulf %9, %8 : vector<16x64xf32>
    %cst_7 = arith.constant 4.471500e-02 : f32
    %11 = vector.broadcast %cst_7 : f32 to vector<16x64xf32>
    %12 = arith.mulf %11, %8 : vector<16x64xf32>
    %13 = arith.mulf %12, %8 : vector<16x64xf32>
    %14 = arith.mulf %13, %8 : vector<16x64xf32>
    %15 = arith.addf %8, %14 : vector<16x64xf32>
    %cst_8 = arith.constant 0.797884583 : f32
    %16 = vector.broadcast %cst_8 : f32 to vector<16x64xf32>
    %17 = arith.mulf %16, %15 : vector<16x64xf32>
    %18 = math.tanh %17 : vector<16x64xf32>
    %cst_9 = arith.constant 1.000000e+00 : f32
    %19 = vector.broadcast %cst_9 : f32 to vector<16x64xf32>
    %20 = arith.addf %19, %18 : vector<16x64xf32>
    %21 = arith.mulf %10, %20 : vector<16x64xf32>
    %c0_10 = arith.constant 0 : index
    %c0_11 = arith.constant 0 : index
    %22 = vector.load %arg11[%c0_10, %c0_11] : memref<16x32xf32, #tpu.memory_space<vmem>>, vector<16x32xf32>
    %c0_12 = arith.constant 0 : index
    %c0_13 = arith.constant 0 : index
    %23 = vector.load %arg7[%c0_12, %c0_13] : memref<64x32xf32, #tpu.memory_space<vmem>>, vector<64x32xf32>
    %cst_14 = arith.constant dense<0.000000e+00> : vector<16x32xf32>
    %24 = tpu.matmul %21, %23, %cst_14 {dimension_numbers = #tpu.dot_dimension_numbers<[1], [0], [0], [1], [0, 0, 1, 1], [], []>} : vector<16x64xf32>, vector<64x32xf32>, vector<16x32xf32> -> vector<16x32xf32>
    %25 = arith.addf %22, %24 : vector<16x32xf32>
    %c0_15 = arith.constant 0 : index
    %c0_16 = arith.constant 0 : index
    %26 = vector.load %arg11[%c0_15, %c0_16] : memref<16x32xf32, #tpu.memory_space<vmem>>, vector<16x32xf32>
    tpu.vector_store %arg11[%c0_15, %c0_16], %25 {strides = array<i32>} : memref<16x32xf32, #tpu.memory_space<vmem>>, vector<16x32xf32>,
    %c0_i32_17 = arith.constant 0 : i32
    %27 = arith.cmpi eq, %arg1, %c0_i32_17 : i32
    %28 = arith.extui %27 : i1 to i32
    %c0_i32_18 = arith.constant 0 : i32
    %29 = arith.cmpi ne, %28, %c0_i32_18 : i32
    scf.if %29 {
      %c0_19 = arith.constant 0 : index
      %c0_20 = arith.constant 0 : index
      %30 = vector.load %arg11[%c0_19, %c0_20] : memref<16x32xf32, #tpu.memory_space<vmem>>, vector<16x32xf32>
      %c0_21 = arith.constant 0 : index
      %c0_22 = arith.constant 0 : index
      %31 = vector.load %arg8[%c0_21, %c0_22] : memref<1x32xf32, #tpu.memory_space<vmem>>, vector<1x32xf32>
      %32 = vector.broadcast %31 : vector<1x32xf32> to vector<16x32xf32>
      %33 = arith.addf %30, %32 : vector<16x32xf32>
      %c0_23 = arith.constant 0 : index
      %c0_24 = arith.constant 0 : index
      %34 = vector.load %arg2[%c0_23, %c0_24] : memref<16x32xf32, #tpu.memory_space<vmem>>, vector<16x32xf32>
      %35 = arith.addf %33, %34 : vector<16x32xf32>
      %c0_25 = arith.constant 0 : index
      %c0_26 = arith.constant 0 : index
      %36 = vector.load %arg9[%c0_25, %c0_26] : memref<16x32xf32, #tpu.memory_space<vmem>>, vector<16x32xf32>
      tpu.vector_store %arg9[%c0_25, %c0_26], %35 {strides = array<i32>} : memref<16x32xf32, #tpu.memory_space<vmem>>, vector<16x32xf32>,
    } else {
    }
    return
  }
  func.func @transform_0(%arg0: i32, %arg1: i32) -> (i32, i32) {
    %c0_i32 = arith.constant 0 : i32
    %c0_i32_0 = arith.constant 0 : i32
    return %arg0, %c0_i32 : i32, i32
  }
  func.func @transform_1(%arg0: i32, %arg1: i32) -> (i32, i32) {
    %c0_i32 = arith.constant 0 : i32
    %c0_i32_0 = arith.constant 0 : i32
    %c0_i32_1 = arith.constant 0 : i32
    return %c0_i32, %c0_i32_0 : i32, i32
  }
  func.func @transform_2(%arg0: i32, %arg1: i32) -> (i32, i32) {
    %c0_i32 = arith.constant 0 : i32
    %c0_i32_0 = arith.constant 0 : i32
    %c0_i32_1 = arith.constant 0 : i32
    return %c0_i32, %c0_i32_0 : i32, i32
  }
  func.func @transform_3(%arg0: i32, %arg1: i32) -> (i32, i32) {
    %c0_i32 = arith.constant 0 : i32
    %c0_i32_0 = arith.constant 0 : i32
    return %c0_i32, %arg1 : i32, i32
  }
  func.func @transform_4(%arg0: i32, %arg1: i32) -> (i32, i32) {
    %c0_i32 = arith.constant 0 : i32
    %c0_i32_0 = arith.constant 0 : i32
    return %c0_i32, %arg1 : i32, i32
  }
  func.func @transform_5(%arg0: i32, %arg1: i32) -> (i32, i32) {
    %c0_i32 = arith.constant 0 : i32
    %c0_i32_0 = arith.constant 0 : i32
    return %arg1, %c0_i32 : i32, i32
  }
  func.func @transform_6(%arg0: i32, %arg1: i32) -> (i32, i32) {
    %c0_i32 = arith.constant 0 : i32
    %c0_i32_0 = arith.constant 0 : i32
    %c0_i32_1 = arith.constant 0 : i32
    return %c0_i32, %c0_i32_0 : i32, i32
  }
  func.func @transform_7(%arg0: i32, %arg1: i32) -> (i32, i32) {
    %c0_i32 = arith.constant 0 : i32
    %c0_i32_0 = arith.constant 0 : i32
    return %arg0, %c0_i32 : i32, i32
  }
}

module attributes {stable_mosaic.version = 11 : i64} {
  func.func @_out_proj_kernel(%arg0: i32, %arg1: i32, %arg2: memref<16x32xf32, #tpu.memory_space<vmem>>, %arg3: memref<32x32xf32, #tpu.memory_space<vmem>>, %arg4: memref<1x32xf32, #tpu.memory_space<vmem>>, %arg5: memref<16x32xf32, #tpu.memory_space<vmem>>, %arg6: memref<16x32xf32, #tpu.memory_space<vmem>>) attributes {dimension_semantics = [#tpu.dimension_semantics<parallel>, #tpu.dimension_semantics<parallel>], iteration_bounds = array<i64: 1, 1>, scalar_prefetch = 0 : i64, scratch_operands = 0 : i64, tpu.core_type = #tpu.core_type<tc>, window_params = [{transform_indices = @transform_0, window_bounds = array<i64: 16, 32>}, {transform_indices = @transform_1, window_bounds = array<i64: 32, 32>}, {transform_indices = @transform_2, window_bounds = array<i64: 1, 32>}, {transform_indices = @transform_3, window_bounds = array<i64: 16, 32>}, {transform_indices = @transform_4, window_bounds = array<i64: 16, 32>}]} {
    %c0 = arith.constant 0 : index
    %c0_0 = arith.constant 0 : index
    %0 = vector.load %arg2[%c0, %c0_0] : memref<16x32xf32, #tpu.memory_space<vmem>>, vector<16x32xf32>
    %c0_1 = arith.constant 0 : index
    %c0_2 = arith.constant 0 : index
    %1 = vector.load %arg3[%c0_1, %c0_2] : memref<32x32xf32, #tpu.memory_space<vmem>>, vector<32x32xf32>
    %cst = arith.constant dense<0.000000e+00> : vector<16x32xf32>
    %2 = tpu.matmul %0, %1, %cst {dimension_numbers = #tpu.dot_dimension_numbers<[1], [0], [0], [1], [0, 0, 1, 1], [], []>} : vector<16x32xf32>, vector<32x32xf32>, vector<16x32xf32> -> vector<16x32xf32>
    %c0_3 = arith.constant 0 : index
    %c0_4 = arith.constant 0 : index
    %3 = vector.load %arg4[%c0_3, %c0_4] : memref<1x32xf32, #tpu.memory_space<vmem>>, vector<1x32xf32>
    %4 = vector.broadcast %3 : vector<1x32xf32> to vector<16x32xf32>
    %5 = arith.addf %2, %4 : vector<16x32xf32>
    %c0_5 = arith.constant 0 : index
    %c0_6 = arith.constant 0 : index
    %6 = vector.load %arg5[%c0_5, %c0_6] : memref<16x32xf32, #tpu.memory_space<vmem>>, vector<16x32xf32>
    %7 = arith.addf %5, %6 : vector<16x32xf32>
    %c0_7 = arith.constant 0 : index
    %c0_8 = arith.constant 0 : index
    %8 = vector.load %arg6[%c0_7, %c0_8] : memref<16x32xf32, #tpu.memory_space<vmem>>, vector<16x32xf32>
    tpu.vector_store %arg6[%c0_7, %c0_8], %7 {strides = array<i32>} : memref<16x32xf32, #tpu.memory_space<vmem>>, vector<16x32xf32>,
    return
  }
  func.func @transform_0(%arg0: i32, %arg1: i32) -> (i32, i32) {
    %c0_i32 = arith.constant 0 : i32
    %c0_i32_0 = arith.constant 0 : i32
    return %arg0, %c0_i32 : i32, i32
  }
  func.func @transform_1(%arg0: i32, %arg1: i32) -> (i32, i32) {
    %c0_i32 = arith.constant 0 : i32
    %c0_i32_0 = arith.constant 0 : i32
    return %c0_i32, %arg1 : i32, i32
  }
  func.func @transform_2(%arg0: i32, %arg1: i32) -> (i32, i32) {
    %c0_i32 = arith.constant 0 : i32
    %c0_i32_0 = arith.constant 0 : i32
    return %c0_i32, %arg1 : i32, i32
  }
  func.func @transform_3(%arg0: i32, %arg1: i32) -> (i32, i32) {
    %c0_i32 = arith.constant 0 : i32
    return %arg0, %arg1 : i32, i32
  }
  func.func @transform_4(%arg0: i32, %arg1: i32) -> (i32, i32) {
    %c0_i32 = arith.constant 0 : i32
    return %arg0, %arg1 : i32, i32
  }
}

module attributes {stable_mosaic.version = 11 : i64} {
  func.func @_layernorm_kernel(%arg0: i32, %arg1: memref<16x32xf32, #tpu.memory_space<vmem>>, %arg2: memref<1x32xf32, #tpu.memory_space<vmem>>, %arg3: memref<1x32xf32, #tpu.memory_space<vmem>>, %arg4: memref<16x32xf32, #tpu.memory_space<vmem>>) attributes {dimension_semantics = [#tpu.dimension_semantics<parallel>], iteration_bounds = array<i64: 1>, scalar_prefetch = 0 : i64, scratch_operands = 0 : i64, tpu.core_type = #tpu.core_type<tc>, window_params = [{transform_indices = @transform_0, window_bounds = array<i64: 16, 32>}, {pipeline_mode = #tpu.pipeline_mode<synchronous>, transform_indices = @transform_1, window_bounds = array<i64: 1, 32>}, {pipeline_mode = #tpu.pipeline_mode<synchronous>, transform_indices = @transform_2, window_bounds = array<i64: 1, 32>}, {transform_indices = @transform_3, window_bounds = array<i64: 16, 32>}]} {
    %c0 = arith.constant 0 : index
    %c0_0 = arith.constant 0 : index
    %0 = vector.load %arg1[%c0, %c0_0] : memref<16x32xf32, #tpu.memory_space<vmem>>, vector<16x32xf32>
    %c0_1 = arith.constant 0 : index
    %c0_2 = arith.constant 0 : index
    %1 = vector.load %arg2[%c0_1, %c0_2] : memref<1x32xf32, #tpu.memory_space<vmem>>, vector<1x32xf32>
    %c0_3 = arith.constant 0 : index
    %c0_4 = arith.constant 0 : index
    %2 = vector.load %arg3[%c0_3, %c0_4] : memref<1x32xf32, #tpu.memory_space<vmem>>, vector<1x32xf32>
    %cst = arith.constant dense<0.000000e+00> : vector<16xf32>
    %3 = vector.multi_reduction <add>, %0, %cst [1] : vector<16x32xf32> to vector<16xf32>
    %4 = vector.shape_cast %3 : vector<16xf32> to vector<16x1xf32>
    %cst_5 = arith.constant 3.200000e+01 : f32
    %5 = vector.broadcast %cst_5 : f32 to vector<16x1xf32>
    %6 = arith.divf %4, %5 : vector<16x1xf32>
    %7 = vector.broadcast %6 : vector<16x1xf32> to vector<16x32xf32>
    %8 = arith.subf %0, %7 : vector<16x32xf32>
    %9 = arith.mulf %8, %8 : vector<16x32xf32>
    %cst_6 = arith.constant dense<0.000000e+00> : vector<16xf32>
    %10 = vector.multi_reduction <add>, %9, %cst_6 [1] : vector<16x32xf32> to vector<16xf32>
    %11 = vector.shape_cast %10 : vector<16xf32> to vector<16x1xf32>
    %cst_7 = arith.constant 3.200000e+01 : f32
    %12 = vector.broadcast %cst_7 : f32 to vector<16x1xf32>
    %13 = arith.divf %11, %12 : vector<16x1xf32>
    %14 = vector.broadcast %6 : vector<16x1xf32> to vector<16x32xf32>
    %15 = arith.subf %0, %14 : vector<16x32xf32>
    %cst_8 = arith.constant 9.99999974E-6 : f32
    %16 = vector.broadcast %cst_8 : f32 to vector<16x1xf32>
    %17 = arith.addf %13, %16 : vector<16x1xf32>
    %18 = math.rsqrt %17 : vector<16x1xf32>
    %19 = vector.broadcast %18 : vector<16x1xf32> to vector<16x32xf32>
    %20 = arith.mulf %15, %19 : vector<16x32xf32>
    %21 = vector.broadcast %1 : vector<1x32xf32> to vector<16x32xf32>
    %22 = arith.mulf %20, %21 : vector<16x32xf32>
    %23 = vector.broadcast %2 : vector<1x32xf32> to vector<16x32xf32>
    %24 = arith.addf %22, %23 : vector<16x32xf32>
    %c0_9 = arith.constant 0 : index
    %c0_10 = arith.constant 0 : index
    %25 = vector.load %arg4[%c0_9, %c0_10] : memref<16x32xf32, #tpu.memory_space<vmem>>, vector<16x32xf32>
    tpu.vector_store %arg4[%c0_9, %c0_10], %24 {strides = array<i32>} : memref<16x32xf32, #tpu.memory_space<vmem>>, vector<16x32xf32>,
    return
  }
  func.func @transform_0(%arg0: i32) -> (i32, i32) {
    %c0_i32 = arith.constant 0 : i32
    %c0_i32_0 = arith.constant 0 : i32
    return %arg0, %c0_i32 : i32, i32
  }
  func.func @transform_1(%arg0: i32) -> (i32, i32) {
    %c0_i32 = arith.constant 0 : i32
    %c0_i32_0 = arith.constant 0 : i32
    %c0_i32_1 = arith.constant 0 : i32
    return %c0_i32, %c0_i32_0 : i32, i32
  }
  func.func @transform_2(%arg0: i32) -> (i32, i32) {
    %c0_i32 = arith.constant 0 : i32
    %c0_i32_0 = arith.constant 0 : i32
    %c0_i32_1 = arith.constant 0 : i32
    return %c0_i32, %c0_i32_0 : i32, i32
  }
  func.func @transform_3(%arg0: i32) -> (i32, i32) {
    %c0_i32 = arith.constant 0 : i32
    %c0_i32_0 = arith.constant 0 : i32
    return %arg0, %c0_i32 : i32, i32
  }
}

</mosaic_0001>

<bundles_post_ra>
// kernel: encoder_forward.9
= control target key start
LH: loop header
LB: loop body
LE: loop exit
PB: predicated region body
PF: predicated region fallthrough
CT: control target
= control target key end

     0   :  { %17 = vsyncpa [#allocation4], 0  ;;  %s486_s0 = inlined_call_operand.vmem [shape: f32[16,32], index: 0, kind: input, shape index: {}]   ;;  %s487_s1 = inlined_call_operand.vmem [shape: f32[1,32], index: 1, kind: input, shape index: {}]   ;;  %s488_s2 = inlined_call_operand.vmem [shape: f32[1,32], index: 2, kind: input, shape index: {}]   ;;  %s489_s3 = inlined_call_operand.vmem [shape: f32[32,32], index: 3, kind: input, shape index: {}]   ;;  %s490_s4 = inlined_call_operand.vmem [shape: f32[1,32], index: 4, kind: input, shape index: {}]   ;;  %s491_s5 = inlined_call_operand.hbm [shape: f32[32,32], index: 5, kind: input, shape index: {}]   ;;  %s492_s6 = inlined_call_operand.vmem [shape: f32[1,32], index: 6, kind: input, shape index: {}]   ;;  %s493_s7 = inlined_call_operand.hbm [shape: f32[32,32], index: 7, kind: input, shape index: {}]   ;;  %s494_s8 = inlined_call_operand.vmem [shape: f32[1,32], index: 8, kind: input, shape index: {}]   ;;  %s495_s9 = inlined_call_operand.vmem [shape: f32[16,32], index: 9, kind: output, shape index: {0}]   ;;  %s496_s10 = inlined_call_operand.vmem [shape: f32[16,32], index: 10, kind: output, shape index: {1}]   ;;  %s497_s11 = inlined_call_operand.vmem [shape: f32[16,32], index: 11, kind: output, shape index: {2}]  }
   0x1   :  { %s33_s19 = sshll.u32 %s491_s5, 4  ;;  %s34_s19 = int_to_ptr.hbm [resolvable:$true] %s33_s19 }
   0x2   :  { %18 = vsyncpa [#allocation6], 0  ;;  %s341_s20 = smov [#allocation3]   ;;  %s48_s24 = sshll.u32 %s493_s7, 4  ;;  %s49_s24 = int_to_ptr.hbm [resolvable:$true] %s48_s24 }
   0x3   :  { %s35_s21 = sshll.u32 %s341_s20, 4  ;;  %s342_s25 = smov 128   ;;  %s36_s21 = int_to_ptr.vmem [resolvable:$true] %s35_s21 }
   0x4   :  { %s343_s26 = smov 8   ;;  %s344_s27 = smov [#allocation5]  }
   0x5   :  { %41 = dma.hbm_to_vmem [thread:$0]  %s34_s19, 512, %s36_s21, [#allocation4], %s342_s25, %s342_s25, %s343_s26  }
   0x6   :  { %s50_s28 = sshll.u32 %s344_s27, 4  ;;  %s51_s28 = int_to_ptr.vmem [resolvable:$true] %s50_s28 }
   0x7   :  { %56 = dma.hbm_to_vmem [thread:$0]  %s49_s24, 512, %s51_s28, [#allocation6], %s342_s25, %s342_s25, %s343_s26  }
   0x8   :  { %337 = dma.done.wait [#allocation4], 512  }
   0x9   :  { %338 = vsyncadd [#allocation4], 4294966784 }
   0xa   :  { %339 = dma.done.wait [#allocation6], 512  }
   0xb   :  { %340 = vsyncadd [#allocation6], 4294966784  ;;  %vm75_vm0 = vcmask 261120   ;;  %v71_v0 = vld [vmem:[%s486_s0] sm:$0xff]  ;;  %v72_v2 = vld [vmem:[%s486_s0 + $0x8] sm:$0xff]  ;;  %v345_v4 = vmov 32.0  }
   0xc   :  { %v76_v1 = vsel %vm75_vm0, %v71_v0, 0.0  ;;  %v79_v3 = vsel %vm75_vm0, %v72_v2, 0.0  ;;  %283 = vrcp.f32 %v345_v4  ;;  %v144_v21 = vld [vmem:[%s489_s3 + $0x18] sm:$0xff]  ;;  %v186_v22 = vld [vmem:[#allocation3 + $0x18] sm:$0xff]  ;;  %v143_v24 = vld [vmem:[%s489_s3 + $0x10] sm:$0xff] }
   0xd   :  { %77 = vadd.xlane.f32.xlu0 %v76_v1  ;;  %v219_v23 = vld [vmem:[#allocation5 + $0x18] sm:$0xff]  ;;  %168 = vmatpush.msra.mxu0 %v144_v21  ;;  %v185_v25 = vld [vmem:[#allocation3 + $0x10] sm:$0xff]  ;;  %v184_v30 = vld [vmem:[#allocation3 + $0x8] sm:$0xff] }
   0xe   :  { %203 = vmatpush.msra.mxu1 %v186_v22  ;;  %236 = vmatpush.msra.mxu2 %v219_v23  ;;  %v218_v26 = vld [vmem:[#allocation5 + $0x10] sm:$0xff]  ;;  %v142_v29 = vld [vmem:[%s489_s3 + $0x8] sm:$0xff]  ;;  %v217_v31 = vld [vmem:[#allocation5 + $0x8] sm:$0xff] }
   0xf   :  { %269 = vmatpush.msra.mxu3 %v144_v21  ;;  %169 = vmatpush.msra.mxu0 %v143_v24  ;;  %v141_v33 = vld [vmem:[%s489_s3] sm:$0xff]  ;;  %v183_v34 = vld [vmem:[#allocation3] sm:$0xff] }
  0x10   :  { %204 = vmatpush.msra.mxu1 %v185_v25  ;;  %237 = vmatpush.msra.mxu2 %v218_v26  ;;  %v216_v35 = vld [vmem:[#allocation5] sm:$0xff]  ;;  %v278_v47 = vld [vmem:[%s487_s1] ss:$0 sm:$0xff] }
  0x11   :  { %270 = vmatpush.msra.mxu3 %v143_v24  ;;  %170 = vmatpush.msra.mxu0 %v142_v29  ;;  %v279_v50 = vld [vmem:[%s488_s2] ss:$0 sm:$0xff] }
  0x12   :  { %v284_v5 = vpop.eup %283  ;;  %205 = vmatpush.msra.mxu1 %v184_v30  ;;  %238 = vmatpush.msra.mxu2 %v217_v31  ;;  %v280_v63 = vld [vmem:[%s490_s4] ss:$0 sm:$0xff] }
  0x13   :  { %v83_v6 = vmul.f32 32.0, %v284_v5  ;;  %vm87_vm1 = vweird.f32 %v284_v5  ;;  %271 = vmatpush.msra.mxu3 %v142_v29  ;;  %171 = vmatpush.msra.mxu0 %v141_v33 }
  0x14   :  { %206 = vmatpush.msra.mxu1 %v183_v34  ;;  %239 = vmatpush.msra.mxu2 %v216_v35 }
  0x15   :  { %80 = vadd.xlane.f32.xlu0 %v79_v3  ;;  %v84_v7 = vsub.f32 1.0, %v83_v6  ;;  %272 = vmatpush.msra.mxu3 %v141_v33  ;;  %v282_v6 = vld [vmem:[%s494_s8] ss:$0 sm:$0xff] }
  0x17   :  { %v85_v8 = vmul.f32 %v284_v5, %v84_v7 }
  0x19   :  { %v86_v9 = vadd.f32 %v284_v5, %v85_v8 }
  0x1b   :  { %v88_v10 = vsel %vm87_vm1, %v284_v5, %v86_v9 }
  0x80   :  { %v78_v11 = vpop.xlane.xlu0 %77 }
  0x81   :  { %v89_v12 = vmul.f32 %v88_v10, %v78_v11 }
  0x83   :  { %v91_v13 = vsub.f32 %v71_v0, %v89_v12  ;;  %v281_v0 = vld [vmem:[%s492_s6] ss:$0 sm:$0xff] }
  0x85   :  { %v93_v14 = vmul.f32 %v91_v13, %v91_v13 }
  0x87   :  { %v95_v15 = vsel %vm75_vm0, %v93_v14, 0.0 }
  0x88   :  { %96 = vadd.xlane.f32.xlu1 %v95_v15  ;;  %v81_v16 = vpop.xlane.xlu0 %80 }
  0x89   :  { %v90_v17 = vmul.f32 %v88_v10, %v81_v16 }
  0x8b   :  { %v421_v18 = vsub.f32 %v72_v2, %v90_v17 }
  0x8d   :  { %v94_v19 = vmul.f32 %v421_v18, %v421_v18 }
  0x8f   :  { %v98_v20 = vsel %vm75_vm0, %v94_v19, 0.0 }
  0x90   :  { %99 = vadd.xlane.f32.xlu1 %v98_v20 }
  0xfb   :  { %v97_v27 = vpop.xlane.xlu1 %96 }
  0xfc   :  { %v101_v28 = vmul.f32 %v97_v27, %v88_v10 }
  0xfe   :  { %v103_v32 = vadd.f32 1e-05, %v101_v28 }
 0x100   :  { %285 = vrsqrt.f32 %v103_v32  ;;  %vm111_vm3 = vweird.f32 %v103_v32 }
 0x103   :  { %v100_v36 = vpop.xlane.xlu1 %99 }
 0x104   :  { %v102_v37 = vmul.f32 %v100_v36, %v88_v10 }
 0x106   :  { %v286_v38 = vpop.eup %285  ;;  %v104_v39 = vadd.f32 1e-05, %v102_v37 }
 0x107   :  { %v106_v40 = vmul.f32 %v286_v38, %v103_v32  ;;  %vm112_vm2 = vweird.f32 %v286_v38 }
 0x108   :  { %287 = vrsqrt.f32 %v104_v39  ;;  %vm113_vm4 = vmor %vm111_vm3, %vm112_vm2  ;;  %vm121_vm6 = vweird.f32 %v104_v39 }
 0x109   :  { %v107_v41 = vmul.f32 %v286_v38, %v106_v40 }
 0x10b   :  { %v108_v42 = vmul.f32 0.5, %v107_v41 }
 0x10d   :  { %v109_v43 = vsub.f32 1.5, %v108_v42 }
 0x10e   :  { %v288_v44 = vpop.eup %287 }
 0x10f   :  { %v110_v45 = vmul.f32 %v286_v38, %v109_v43  ;;  %v116_v46 = vmul.f32 %v288_v44, %v104_v39  ;;  %vm122_vm5 = vweird.f32 %v288_v44 }
 0x110   :  { %vm123_vm7 = vmor %vm121_vm6, %vm122_vm5 }
 0x111   :  { %v114_v48 = vsel %vm113_vm4, %v286_v38, %v110_v45  ;;  %v117_v49 = vmul.f32 %v288_v44, %v116_v46 }
 0x112   :  { %v125_v51 = vmul.f32 %v114_v48, %v91_v13 }
 0x113   :  { %v118_v52 = vmul.f32 0.5, %v117_v49 }
 0x114   :  { %v130_v53 = vmul.f32 %v278_v47, %v125_v51 }
 0x115   :  { %v119_v54 = vsub.f32 1.5, %v118_v52 }
 0x116   :  { %v135_v55 = vadd.f32 %v279_v50, %v130_v53 }
 0x117   :  { %v120_v56 = vmul.f32 %v288_v44, %v119_v54 }
 0x118   :  { %137 = vst.msk [vmem:[#allocation2] sm:$0xff] %vm75_vm0, %v135_v55 }
 0x119   :  { %v124_v57 = vsel %vm123_vm7, %v288_v44, %v120_v56 }
 0x11a   :  { %v126_v58 = vmul.f32 %v124_v57, %v421_v18 }
 0x11c   :  { %v131_v59 = vmul.f32 %v278_v47, %v126_v58 }
 0x11e   :  { %v136_v60 = vadd.f32 %v279_v50, %v131_v59 }
 0x11f   :  { %v139_v61 = vld [vmem:[#allocation2] sm:$0xff] }
 0x120   :  { %138 = vst.msk [vmem:[#allocation2 + $0x8] sm:$0xff] %vm75_vm0, %v136_v60  ;;  %263 = vmatmul.msk.f32.vlgmr.msra.gmra.mxu0 %vm75_vm0, %v139_v61  ;;  %265 = vmatmul.msk.f32.vlgmr.msra.gmra.mxu1 %vm75_vm0, %v139_v61 }
 0x121   :  { %267 = vmatmul.msk.f32.vlgmr.msra.gmra.mxu2 %vm75_vm0, %v139_v61 }
 0x127   :  { %v140_v62 = vld [vmem:[#allocation2 + $0x8] sm:$0xff] }
 0x128   :  { %264 = vmatmul.msk.f32.vlgmr.msra.gmra.mxu3 %vm75_vm0, %v140_v62  ;;  %266 = vmatmul.msk.f32.gmra.mxu1 %vm75_vm0, %v140_v62 }
 0x129   :  { %268 = vmatmul.msk.f32.gmra.mxu2 %vm75_vm0, %v140_v62 }
 0x19d   :  { %v173_v1 = vpop.f32.mrf.mxu0  ;;  %v208_v2 = vpop.f32.mrf.mxu1 }
 0x19e   :  { %v174_v3 = vadd.f32 %v280_v63, %v173_v1  ;;  %v209_v4 = vadd.f32 %v281_v0, %v208_v2 }
 0x1a0   :  { %v179_v5 = vmul.f32 0.35355338, %v174_v3  ;;  %214 = vst.msk [vmem:[%s496_s10] sm:$0xff] %vm75_vm0, %v209_v4 }
 0x1a2   :  { %181 = vst.msk [vmem:[%s495_s9] sm:$0xff] %vm75_vm0, %v179_v5 }
 0x1a4   :  { %v241_v7 = vpop.f32.mrf.mxu2 }
 0x1a5   :  { %v242_v8 = vadd.f32 %v282_v6, %v241_v7  ;;  %v211_v9 = vpop.f32.mrf.mxu1 }
 0x1a6   :  { %v212_v10 = vadd.f32 %v281_v0, %v211_v9 }
 0x1a7   :  { %247 = vst.msk [vmem:[%s497_s11] sm:$0xff] %vm75_vm0, %v242_v8 }
 0x1a8   :  { %215 = vst.msk [vmem:[%s496_s10 + $0x8] sm:$0xff] %vm75_vm0, %v212_v10 }
 0x1ab   :  { %v176_v11 = vpop.f32.mrf.mxu3 }
 0x1ac   :  { %v177_v12 = vadd.f32 %v280_v63, %v176_v11  ;;  %v244_v13 = vpop.f32.mrf.mxu2 }
 0x1ad   :  { %v245_v14 = vadd.f32 %v282_v6, %v244_v13 }
 0x1ae   :  { %v180_v15 = vmul.f32 0.35355338, %v177_v12 }
 0x1af   :  { %248 = vst.msk [vmem:[%s497_s11 + $0x8] sm:$0xff] %vm75_vm0, %v245_v14 }
 0x1b0   :  { %182 = vst.msk [vmem:[%s495_s9 + $0x8] sm:$0xff] %vm75_vm0, %v180_v15 }
 0x1b1   :  { %261 = vsyncpa [#allocation4], 1 }
 0x1b2   :  { %262 = vsyncpa [#allocation6], 1 }

// kernel: encoder_forward.10
= control target key start
LH: loop header
LB: loop body
LE: loop exit
PB: predicated region body
PF: predicated region fallthrough
CT: control target
= control target key end

     0   :  { %s909_s15 = smov 0   ;;  %s911_s16 = smov 0   ;;  %s1006_s0 = inlined_call_operand.vmem [shape: f32[2,8,32], index: 0, kind: input, shape index: {}]   ;;  %s1007_s1 = inlined_call_operand.vmem [shape: f32[2,8,32], index: 1, kind: input, shape index: {}]   ;;  %s1008_s2 = inlined_call_operand.vmem [shape: f32[2,8,32], index: 2, kind: input, shape index: {}]   ;;  %s1009_s3 = inlined_call_operand.vmem [shape: f32[2,1,8], index: 3, kind: input, shape index: {}]   ;;  %s1010_s4 = inlined_call_operand.vmem [shape: f32[2,8,32], index: 4, kind: output, shape index: {}]  }
   0x1   :  { %s913_s17 = smov 0  }
   0x2 LB: > { %s33_s18 = sadd.s32 1, %s872_s16  ;;  %p788_p0 = scmp.ge.s32.totalorder %s876_s17, 1  ;;  %s876_s17 = sphi %s913_s17, %s14_s17   ;;  %s872_s16 = sphi %s911_s16, %s1012_s16   ;;  %s868_s15 = sphi %s909_s15, %s1011_s15  }
   0x3   : > { %p35_p1 = scmp.ge.s32.totalorder %s33_s18, 2  ;;  %p230_p2 = scmp.lt.s32.totalorder %s876_s17, 3 }
   0x5   : > { %s1014_s18 = smov (%p35_p1, %s33_s18), 0  ;;  %p231_p3 = pnand %p788_p0, %p230_p2 }
   0x6   : > { %p283_p4 = scmp.lt.s32.totalorder (!%p231_p3), %s868_s15, 1  ;;  %s878_s29 = smov (!%p231_p3), 120  }
   0x7   : > { %234 = sbr.rel (%p231_p3) target bundleno = 1061 (0x425), region = 36  ;;  %s879_s30 = smov (!%p231_p3), 112  }
   0x8   : > { %s880_s5 = smov (!%p231_p3), 104   ;;  %s881_s9 = smov (!%p231_p3), 24  }
   0x9   : > { %s882_s10 = smov (!%p231_p3), 8   ;;  %s883_s11 = smov (!%p231_p3), 16  }
   0xc   : > { %s1016_s15 = smov (!%p283_p4, %s868_s15), 1  ;;  %vm327_vm0 = vcmask 64512  }
   0xd   : > { %s927_s19 = sshll.u32 %s1016_s15, 3  ;;  %s309_s22 = scalar_lea.vmem %s1009_s3, %s1016_s15 }
   0xe   : > { %s299_s25 = scalar_lea.vmem %s1007_s1, %s927_s19  ;;  %s292_s28 = scalar_lea.vmem %s1006_s0, %s927_s19  ;;  %v949_v4 = vld [vmem:[%s309_s22] ss:$0 sm:$0xff] }
   0xf   : > { %v322_v0 = vld [vmem:[%s299_s25] sm:$0xff]  ;;  %s306_s8 = scalar_lea.vmem %s1008_s2, %s927_s19  ;;  %s319_s14 = scalar_lea.vmem %s1010_s4, %s927_s19 }
  0x10   : > { %793 = vmatpush.xpose.msk.msra.mxu0 %vm327_vm0, %v322_v0  ;;  %v321_v1 = vld [vmem:[%s292_s28] sm:$0xff]  ;;  %403 = vrot.lane.b32.xlu1 %v322_v0, %s878_s29 }
  0x11   : > { %482 = vrot.lane.b32.xlu2 %v322_v0, %s879_s30  ;;  %v963_v19 = vld [vmem:[%s306_s8] sm:$0xff] }
  0x12   : > { %396 = vmatpush.msra.mxu1 %v963_v19 }
  0x13   : > { %794 = vmatmul.msk.f32.vlgmr.msra.gmra.mxu0 %vm327_vm0, %v321_v1 }
  0x18   : > { %401 = vrot.lane.b32.xlu1 %v321_v1, %s878_s29 }
  0x19   : > { %560 = vrot.lane.b32.xlu2 %v322_v0, %s880_s5 }
  0x20   : > { %558 = vrot.lane.b32.xlu1 %v321_v1, %s880_s5 }
  0x6b   : > { %v483_v8 = vpop.permute.xlu2 %482 }
  0x6c   : > { %799 = vmatpush.xpose.msk.msrb.mxu1 %vm327_vm0, %v483_v8 }
  0x73   : > { %v561_v9 = vpop.permute.xlu2 %560 }
  0x74   : > { %802 = vmatpush.xpose.msk.msrb.mxu0 %vm327_vm0, %v561_v9 }
  0x82   : > { %v404_v2 = vpop.permute.xlu1 %403 }
  0x83   : > { %796 = vmatpush.xpose.msk.msra.mxu2 %vm327_vm0, %v404_v2 }
  0x8a   : > { %v402_v3 = vpop.permute.xlu1 %401 }
  0x8b   : > { %797 = vmatmul.msk.f32.vlgmr.msra.gmra.mxu2 %vm327_vm0, %v402_v3 }
  0x90   : > { %v351_v5 = vpop.f32.mrf.mxu0 }
  0x91   : > { %v352_v6 = vadd.f32 %v949_v4, %v351_v5 }
  0x92   : > { %v559_v10 = vpop.permute.xlu1 %558 }
  0x93   : > { %v354_v7 = vsel %vm327_vm0, %v352_v6, -inf  ;;  %803 = vmatmul.msk.f32.vlgmr.msrb.gmra.mxu0 %vm327_vm0, %v559_v10 }
  0x94   : > { %355 = vmax.xlane.f32.xlu0 %v354_v7 }
 0x107   : > { %v356_v11 = vpop.xlane.xlu0 %355 }
 0x108   : > { %v357_v12 = vsub.f32 %v352_v6, %v356_v11 }
 0x10a   : > { %v358_v13 = vmul.f32 1.442695, %v357_v12 }
 0x10c   : > { %838 = vpow2.f32 %v358_v13 }
 0x10e   : > { %v426_v14 = vpop.f32.mrf.mxu2 }
 0x10f   : > { %v427_v15 = vadd.f32 %v949_v4, %v426_v14 }
 0x110   : > { %v583_v20 = vpop.f32.mrf.mxu0 }
 0x111   : > { %v429_v16 = vsel %vm327_vm0, %v427_v15, -inf  ;;  %v584_v21 = vadd.f32 %v949_v4, %v583_v20 }
 0x112   : > { %v839_v17 = vpop.eup %838  ;;  %430 = vmax.xlane.f32.xlu2 %v429_v16 }
 0x113   : > { %v360_v18 = vsel %vm327_vm0, %v839_v17, 0.0  ;;  %v586_v22 = vsel %vm327_vm0, %v584_v21, -inf }
 0x114   : > { %361 = vadd.xlane.f32.xlu0 %v360_v18 }
 0x128   : > { %480 = vrot.lane.b32.xlu0 %v321_v1, %s879_s30 }
 0x152   : > { %587 = vmax.xlane.f32.xlu0 %v586_v22 }
 0x166   : > { %610 = vrot.lane.b32.xlu0 %v963_v19, %s880_s5 }
 0x185   : > { %v431_v23 = vpop.xlane.xlu2 %430 }
 0x186   : > { %v432_v24 = vsub.f32 %v427_v15, %v431_v23 }
 0x187   : > { %v362_v25 = vpop.xlane.xlu0 %361 }
 0x188   : > { %840 = vrcp.f32 %v362_v25  ;;  %v433_v26 = vmul.f32 1.442695, %v432_v24  ;;  %v374_v32 = vand.u32 2147483648, %v362_v25  ;;  %v372_v34 = vand.u32 2147483647, %v362_v25 }
 0x189   : > { %vm368_vm2 = vweird.f32 %v362_v25 }
 0x18a   : > { %842 = vpow2.f32 %v433_v26  ;;  %v375_v36 = vor.u32 1.1754944e-38, %v374_v32  ;;  %vm373_vm4 = vcmp.eq.f32.partialorder %v372_v34, 8.507059e+37 }
 0x18e   : > { %v841_v27 = vpop.eup %840 }
 0x18f   : > { %v364_v28 = vmul.f32 %v841_v27, %v362_v25  ;;  %vm369_vm1 = vweird.f32 %v841_v27 }
 0x190   : > { %v969_v29 = vpop.eup %842  ;;  %vm370_vm3 = vmor %vm368_vm2, %vm369_vm1  ;;  %vm649_vm2 = vcmask 130048  }
 0x191   : > { %v365_v30 = vsub.f32 1.0, %v364_v28  ;;  %v435_v31 = vsel %vm327_vm0, %v969_v29, 0.0 }
 0x192   : > { %436 = vadd.xlane.f32.xlu2 %v435_v31 }
 0x193   : > { %v366_v33 = vmul.f32 %v841_v27, %v365_v30 }
 0x195   : > { %v367_v35 = vadd.f32 %v841_v27, %v366_v33 }
 0x197   : > { %v371_v37 = vsel %vm370_vm3, %v841_v27, %v367_v35  ;;  %vm651_vm3 = vcmask 195584  }
 0x198   : > { %v376_v38 = vsel %vm373_vm4, %v375_v36, %v371_v37  ;;  %vm653_vm4 = vcmask 261120  }
 0x199   : > { %v377_v39 = vmul.f32 %v839_v17, %v376_v38 }
 0x19a   : > { %v481_v40 = vpop.permute.xlu0 %480 }
 0x19b   : > { %795 = vmatmul.msk.f32.vlgmr.msra.gmra.mxu1 %vm327_vm0, %v377_v39 }
 0x1a3   : > { %800 = vmatmul.msk.f32.vlgmr.msrb.gmra.mxu1 %vm327_vm0, %v481_v40 }
 0x1c5   : > { %v588_v41 = vpop.xlane.xlu0 %587 }
 0x1c6   : > { %v589_v43 = vsub.f32 %v584_v21, %v588_v41 }
 0x1c8   : > { %v590_v44 = vmul.f32 1.442695, %v589_v43 }
 0x1ca   : > { %844 = vpow2.f32 %v590_v44 }
 0x1d0   : > { %v845_v48 = vpop.eup %844 }
 0x1d1   : > { %v592_v49 = vsel %vm327_vm0, %v845_v48, 0.0 }
 0x1d8   : > { %v611_v50 = vpop.permute.xlu0 %610 }
 0x1d9   : > { %631 = vmatpush.msrb.mxu2 %v611_v50 }
 0x218   : > { %v977_v42 = vpop.f32.mrf.mxu1 }
 0x220   : > { %v505_v45 = vpop.f32.mrf.mxu1 }
 0x221   : > { %v506_v46 = vadd.f32 %v949_v4, %v505_v45  ;;  %v437_v4 = vpop.xlane.xlu2 %436 }
 0x222   : > { %vm443_vm9 = vweird.f32 %v437_v4  ;;  %v449_v9 = vand.u32 2147483648, %v437_v4  ;;  %v447_v11 = vand.u32 2147483647, %v437_v4 }
 0x223   : > { %v508_v47 = vsel %vm327_vm0, %v506_v46, -inf }
 0x224   : > { %509 = vmax.xlane.f32.xlu1 %v508_v47  ;;  %v450_v13 = vor.u32 1.1754944e-38, %v449_v9  ;;  %vm448_vm12 = vcmp.eq.f32.partialorder %v447_v11, 8.507059e+37 }
 0x22c   : > { %593 = vadd.xlane.f32.xlu1 %v592_v49 }
 0x245   : > { %532 = vrot.lane.b32.xlu1 %v963_v19, %s879_s30 }
 0x297   : > { %v510_v51 = vpop.xlane.xlu1 %509 }
 0x298   : > { %v511_v52 = vsub.f32 %v506_v46, %v510_v51 }
 0x29a   : > { %v512_v53 = vmul.f32 1.442695, %v511_v52 }
 0x29c   : > { %846 = vpow2.f32 %v512_v53 }
 0x29f   : > { %v594_v54 = vpop.xlane.xlu1 %593 }
 0x2a0   : > { %848 = vrcp.f32 %v594_v54  ;;  %v606_v60 = vand.u32 2147483648, %v594_v54  ;;  %v604_v62 = vand.u32 2147483647, %v594_v54  ;;  %vm600_vm6 = vweird.f32 %v594_v54 }
 0x2a1   : > { %850 = vrcp.f32 %v437_v4 }
 0x2a2   : > { %v847_v55 = vpop.eup %846  ;;  %v607_v0 = vor.u32 1.1754944e-38, %v606_v60  ;;  %vm605_vm8 = vcmp.eq.f32.partialorder %v604_v62, 8.507059e+37 }
 0x2a3   : > { %v514_v56 = vsel %vm327_vm0, %v847_v55, 0.0 }
 0x2a4   : > { %515 = vadd.xlane.f32.xlu2 %v514_v56 }
 0x2a6   : > { %v849_v57 = vpop.eup %848 }
 0x2a7   : > { %v596_v58 = vmul.f32 %v849_v57, %v594_v54  ;;  %vm601_vm5 = vweird.f32 %v849_v57  ;;  %v851_v5 = vpop.eup %850 }
 0x2a8   : > { %vm602_vm7 = vmor %vm600_vm6, %vm601_vm5  ;;  %v439_v6 = vmul.f32 %v851_v5, %v437_v4  ;;  %vm444_vm10 = vweird.f32 %v851_v5 }
 0x2a9   : > { %v597_v59 = vsub.f32 1.0, %v596_v58  ;;  %vm445_vm11 = vmor %vm443_vm9, %vm444_vm10 }
 0x2aa   : > { %v440_v7 = vsub.f32 1.0, %v439_v6 }
 0x2ab   : > { %v598_v61 = vmul.f32 %v849_v57, %v597_v59 }
 0x2ac   : > { %v441_v8 = vmul.f32 %v851_v5, %v440_v7 }
 0x2ad   : > { %v599_v63 = vadd.f32 %v849_v57, %v598_v61 }
 0x2ae   : > { %v442_v10 = vadd.f32 %v851_v5, %v441_v8 }
 0x2af   : > { %v603_v1 = vsel %vm602_vm7, %v849_v57, %v599_v63 }
 0x2b0   : > { %v608_v2 = vsel %vm605_vm8, %v607_v0, %v603_v1  ;;  %v446_v14 = vsel %vm445_vm11, %v851_v5, %v442_v10 }
 0x2b1   : > { %v609_v3 = vmul.f32 %v845_v48, %v608_v2  ;;  %v451_v15 = vsel %vm448_vm12, %v450_v13, %v446_v14 }
 0x2b3   : > { %804 = vmatmul.msk.f32.vlgmr.msrb.gmra.mxu2 %vm327_vm0, %v609_v3 }
 0x2b7   : > { %v533_v20 = vpop.permute.xlu1 %532 }
 0x2bc   : > { %454 = vrot.lane.b32.xlu2 %v963_v19, %s878_s29  ;;  %v452_v19 = vmul.f32 %v969_v29, %v451_v15 }
 0x317   : > { %v516_v12 = vpop.xlane.xlu2 %515 }
 0x318   : > { %852 = vrcp.f32 %v516_v12  ;;  %v528_v22 = vand.u32 2147483648, %v516_v12  ;;  %v526_v24 = vand.u32 2147483647, %v516_v12  ;;  %vm522_vm14 = vweird.f32 %v516_v12 }
 0x31a   : > { %v529_v26 = vor.u32 1.1754944e-38, %v528_v22  ;;  %vm527_vm1 = vcmp.eq.f32.partialorder %v526_v24, 8.507059e+37 }
 0x31e   : > { %v853_v16 = vpop.eup %852 }
 0x31f   : > { %v518_v17 = vmul.f32 %v853_v16, %v516_v12  ;;  %v455_v18 = vpop.permute.xlu2 %454  ;;  %vm523_vm13 = vweird.f32 %v853_v16 }
 0x320   : > { %475 = vmatpush.msra.mxu3 %v455_v18  ;;  %vm524_vm15 = vmor %vm522_vm14, %vm523_vm13 }
 0x321   : > { %v519_v21 = vsub.f32 1.0, %v518_v17  ;;  %798 = vmatmul.msk.f32.vlgmr.msra.gmra.mxu3 %vm327_vm0, %v452_v19 }
 0x322   : > { %553 = vmatpush.msrb.mxu3 %v533_v20 }
 0x323   : > { %v520_v23 = vmul.f32 %v853_v16, %v519_v21 }
 0x325   : > { %v521_v25 = vadd.f32 %v853_v16, %v520_v23 }
 0x327   : > { %v525_v27 = vsel %vm524_vm15, %v853_v16, %v521_v25 }
 0x328   : > { %v530_v28 = vsel %vm527_vm1, %v529_v26, %v525_v27 }
 0x329   : > { %v531_v30 = vmul.f32 %v847_v55, %v530_v28 }
 0x32b   : > { %801 = vmatmul.msk.f32.vlgmr.msrb.gmra.mxu3 %vm327_vm0, %v531_v30 }
 0x336   : > { %v633_v29 = vpop.f32.mrf.mxu2 }
 0x337   : > { %645 = vrot.lane.b32.xlu1 %v633_v29, %s881_s9 }
 0x3a4   : > { %v477_v31 = vpop.f32.mrf.mxu3 }
 0x3a5   : > { %637 = vrot.lane.b32.xlu2 %v477_v31, %s882_s10 }
 0x3a9   : > { %v646_v36 = vpop.permute.xlu1 %645 }
 0x3ae   : > { %v555_v32 = vpop.f32.mrf.mxu3 }
 0x3af   : > { %641 = vrot.lane.b32.xlu0 %v555_v32, %s883_s11 }
 0x3ff   : > { %v638_v33 = vpop.permute.xlu2 %637 }
 0x400   : > { %v648_v34 = vsel %vm327_vm0, %v977_v42, %v638_v33 }
 0x421   : > { %v642_v35 = vpop.permute.xlu0 %641 }
 0x422   : > { %v650_v37 = vsel %vm649_vm2, %v648_v34, %v642_v35 }
 0x423   : > { %v652_v38 = vsel %vm651_vm3, %v650_v37, %v646_v36 }
 0x424   : > { %654 = vst.msk [vmem:[%s319_s14] sm:$0xff] %vm653_vm4, %v652_v38 }
 0x425 PF: > { %s14_s17 = sadd.s32 1, %s876_s17   ;;  %s1011_s15 = smov %s872_s16 }
 0x426   : > { %p11_p5 = scmp.ge.s32.totalorder %s14_s17, 4   ;;  %s1012_s16 = smov %s1014_s18 }
 0x428   :  { %13 = sbr.rel (!%p11_p5) target bundleno = 2 (0x2), region = 75 }

// kernel: encoder_forward.12
= control target key start
LH: loop header
LB: loop body
LE: loop exit
PB: predicated region body
PF: predicated region fallthrough
CT: control target
= control target key end

     0   :  { %vm34_vm0 = vcmask 261120   ;;  %v255_v4 = vmov 32.0   ;;  %v256_v63 = vmov 0.0   ;;  %vm168_vm8 = vcmask 523264   ;;  %s381_s0 = inlined_call_operand.vmem [shape: f32[16,32], index: 0, kind: input, shape index: {}, may-alias: {0,7}]   ;;  %s382_s1 = inlined_call_operand.vmem [shape: f32[1,32], index: 1, kind: input, shape index: {}]   ;;  %s383_s2 = inlined_call_operand.vmem [shape: f32[1,32], index: 2, kind: input, shape index: {}]   ;;  %s384_s4 = inlined_call_operand.vmem [shape: f32[1,64], index: 4, kind: input, shape index: {}]   ;;  %s385_s3 = inlined_call_operand.vmem [shape: f32[32,64], index: 3, kind: input, shape index: {}]   ;;  %s386_s6 = inlined_call_operand.vmem [shape: f32[1,32], index: 6, kind: input, shape index: {}]   ;;  %s387_s5 = inlined_call_operand.vmem [shape: f32[64,32], index: 5, kind: input, shape index: {}]   ;;  %s388_s7 = inlined_call_operand.vmem [shape: f32[16,32], index: 7, kind: output, shape index: {}, may-alias: {0,7}]  }
   0x1   :  { %v300_v0 = vld [vmem:[%s381_s0 + $0x8] sm:$0xff]  ;;  %v307_v2 = vld [vmem:[%s381_s0] sm:$0xff]  ;;  %245 = vrcp.f32 %v255_v4  ;;  %v105_v21 = vld [vmem:[%s385_s3 + $0x18] sm:$0xff]  ;;  %98 = vst.msk [vmem:[#allocation3] sm:$0xff] %vm34_vm0, %v256_v63 }
   0x2   :  { %v38_v1 = vsel %vm34_vm0, %v300_v0, 0.0  ;;  %v35_v3 = vsel %vm34_vm0, %v307_v2, 0.0  ;;  %227 = vmatpush.msra.mxu3 %v105_v21  ;;  %129 = vmatpush.msra.mxu0 %v105_v21  ;;  %v104_v22 = vld [vmem:[%s385_s3 + $0x10] sm:$0xff]  ;;  %v103_v25 = vld [vmem:[%s385_s3 + $0x8] sm:$0xff]  ;;  %v102_v27 = vld [vmem:[%s385_s3] sm:$0xff]  ;;  %99 = vst.msk [vmem:[#allocation3 + $0x8] sm:$0xff] %vm34_vm0, %v256_v63 }
   0x3   :  { %39 = vadd.xlane.f32.xlu0 %v38_v1  ;;  %v241_v39 = vld [vmem:[%s382_s1] ss:$0 sm:$0xff]  ;;  %v167_v55 = vld [vmem:[%s387_s5 + $0x38] sm:$0xff]  ;;  %v166_v56 = vld [vmem:[%s387_s5 + $0x30] sm:$0xff] }
   0x4   :  { %228 = vmatpush.msra.mxu3 %v104_v22  ;;  %130 = vmatpush.msra.mxu0 %v104_v22  ;;  %v242_v42 = vld [vmem:[%s383_s2] ss:$0 sm:$0xff]  ;;  %v165_v57 = vld [vmem:[%s387_s5 + $0x28] sm:$0xff]  ;;  %v163_v59 = vld [vmem:[%s387_s5 + $0x18] sm:$0xff] }
   0x5   :  { %231 = vmatpush.msra.mxu2 %v167_v55  ;;  %183 = vmatpush.msra.mxu1 %v167_v55  ;;  %v164_v58 = vld [vmem:[%s387_s5 + $0x20] sm:$0xff]  ;;  %v162_v60 = vld [vmem:[%s387_s5 + $0x10] sm:$0xff]  ;;  %v161_v61 = vld [vmem:[%s387_s5 + $0x8] sm:$0xff] }
   0x6   :  { %229 = vmatpush.msra.mxu3 %v103_v25  ;;  %131 = vmatpush.msra.mxu0 %v103_v25  ;;  %v160_v62 = vld [vmem:[%s387_s5] sm:$0xff] }
   0x7   :  { %v246_v5 = vpop.eup %245  ;;  %232 = vmatpush.msra.mxu2 %v166_v56  ;;  %184 = vmatpush.msra.mxu1 %v166_v56  ;;  %v243_v1 = vld [vmem:[%s384_s4] ss:$0 sm:$0xff] }
   0x8   :  { %v42_v6 = vmul.f32 32.0, %v246_v5  ;;  %vm46_vm1 = vweird.f32 %v246_v5  ;;  %230 = vmatpush.msra.mxu3 %v102_v27  ;;  %132 = vmatpush.msra.mxu0 %v102_v27  ;;  %v158_v25 = vld [vmem:[#allocation3] sm:$0xff] }
   0x9   :  { %233 = vmatpush.msra.mxu2 %v165_v57  ;;  %185 = vmatpush.msra.mxu1 %v165_v57 }
   0xa   :  { %v43_v7 = vsub.f32 1.0, %v42_v6 }
   0xb   :  { %36 = vadd.xlane.f32.xlu0 %v35_v3  ;;  %234 = vmatpush.msra.mxu2 %v164_v58 }
   0xc   :  { %v44_v8 = vmul.f32 %v246_v5, %v43_v7  ;;  %186 = vmatpush.msra.mxu1 %v164_v58 }
   0xd   :  { %235 = vmatpush.msra.mxu2 %v163_v59 }
   0xe   :  { %v45_v9 = vadd.f32 %v246_v5, %v44_v8  ;;  %187 = vmatpush.msra.mxu1 %v163_v59 }
   0xf   :  { %236 = vmatpush.msra.mxu2 %v162_v60 }
  0x10   :  { %v47_v10 = vsel %vm46_vm1, %v246_v5, %v45_v9  ;;  %188 = vmatpush.msra.mxu1 %v162_v60 }
  0x11   :  { %237 = vmatpush.msra.mxu2 %v161_v61 }
  0x12   :  { %189 = vmatpush.msra.mxu1 %v161_v61 }
  0x13   :  { %238 = vmatpush.msra.mxu2 %v160_v62 }
  0x14   :  { %190 = vmatpush.msra.mxu1 %v160_v62 }
  0x76   :  { %v40_v11 = vpop.xlane.xlu0 %39 }
  0x77   :  { %v49_v12 = vmul.f32 %v47_v10, %v40_v11 }
  0x79   :  { %v51_v13 = vsub.f32 %v300_v0, %v49_v12 }
  0x7b   :  { %v53_v14 = vmul.f32 %v51_v13, %v51_v13 }
  0x7d   :  { %v57_v15 = vsel %vm34_vm0, %v53_v14, 0.0 }
  0x7e   :  { %58 = vadd.xlane.f32.xlu1 %v57_v15  ;;  %v37_v16 = vpop.xlane.xlu0 %36 }
  0x7f   :  { %v48_v17 = vmul.f32 %v47_v10, %v37_v16 }
  0x81   :  { %v50_v18 = vsub.f32 %v307_v2, %v48_v17 }
  0x83   :  { %v52_v19 = vmul.f32 %v50_v18, %v50_v18 }
  0x85   :  { %v54_v20 = vsel %vm34_vm0, %v52_v19, 0.0 }
  0x86   :  { %55 = vadd.xlane.f32.xlu1 %v54_v20 }
  0xf1   :  { %v59_v23 = vpop.xlane.xlu1 %58 }
  0xf2   :  { %v61_v24 = vmul.f32 %v59_v23, %v47_v10 }
  0xf4   :  { %v63_v26 = vadd.f32 1e-05, %v61_v24 }
  0xf6   :  { %247 = vrsqrt.f32 %v63_v26  ;;  %vm80_vm3 = vweird.f32 %v63_v26 }
  0xf9   :  { %v56_v28 = vpop.xlane.xlu1 %55 }
  0xfa   :  { %v60_v29 = vmul.f32 %v56_v28, %v47_v10  ;;  %v159_v28 = vld [vmem:[#allocation3 + $0x8] sm:$0xff] }
  0xfc   :  { %v248_v30 = vpop.eup %247  ;;  %v62_v31 = vadd.f32 1e-05, %v60_v29 }
  0xfd   :  { %v75_v32 = vmul.f32 %v248_v30, %v63_v26  ;;  %vm81_vm2 = vweird.f32 %v248_v30 }
  0xfe   :  { %249 = vrsqrt.f32 %v62_v31  ;;  %vm82_vm4 = vmor %vm80_vm3, %vm81_vm2  ;;  %vm70_vm6 = vweird.f32 %v62_v31 }
  0xff   :  { %v76_v33 = vmul.f32 %v248_v30, %v75_v32 }
 0x101   :  { %v77_v34 = vmul.f32 0.5, %v76_v33 }
 0x103   :  { %v78_v35 = vsub.f32 1.5, %v77_v34 }
 0x104   :  { %v250_v36 = vpop.eup %249 }
 0x105   :  { %v79_v37 = vmul.f32 %v248_v30, %v78_v35  ;;  %v65_v38 = vmul.f32 %v250_v36, %v62_v31  ;;  %vm71_vm5 = vweird.f32 %v250_v36  ;;  %v244_v31 = vld [vmem:[%s386_s6] ss:$0 sm:$0xff] }
 0x106   :  { %vm72_vm7 = vmor %vm70_vm6, %vm71_vm5 }
 0x107   :  { %v83_v40 = vsel %vm82_vm4, %v248_v30, %v79_v37  ;;  %v66_v41 = vmul.f32 %v250_v36, %v65_v38 }
 0x108   :  { %v85_v43 = vmul.f32 %v83_v40, %v51_v13 }
 0x109   :  { %v67_v44 = vmul.f32 0.5, %v66_v41 }
 0x10a   :  { %v90_v45 = vmul.f32 %v241_v39, %v85_v43 }
 0x10b   :  { %v68_v46 = vsub.f32 1.5, %v67_v44 }
 0x10c   :  { %v95_v47 = vadd.f32 %v242_v42, %v90_v45 }
 0x10d   :  { %v69_v48 = vmul.f32 %v250_v36, %v68_v46 }
 0x10e   :  { %97 = vst.msk [vmem:[#allocation2 + $0x8] sm:$0xff] %vm34_vm0, %v95_v47 }
 0x10f   :  { %v73_v49 = vsel %vm72_vm7, %v250_v36, %v69_v48 }
 0x110   :  { %v84_v50 = vmul.f32 %v73_v49, %v50_v18 }
 0x112   :  { %v89_v51 = vmul.f32 %v241_v39, %v84_v50 }
 0x114   :  { %v94_v52 = vadd.f32 %v242_v42, %v89_v51 }
 0x115   :  { %v101_v53 = vld [vmem:[#allocation2 + $0x8] sm:$0xff] }
 0x116   :  { %96 = vst.msk [vmem:[#allocation2] sm:$0xff] %vm34_vm0, %v94_v52  ;;  %224 = vmatmul.msk.f32.vlgmr.msra.gmra.mxu3 %vm34_vm0, %v101_v53 }
 0x11d   :  { %v100_v54 = vld [vmem:[#allocation2] sm:$0xff] }
 0x11e   :  { %223 = vmatmul.msk.f32.vlgmr.msra.gmra.mxu0 %vm34_vm0, %v100_v54 }
 0x199   :  { %v137_v3 = vpop.f32.mrf.mxu3 }
 0x19a   :  { %v138_v4 = vadd.f32 %v243_v1, %v137_v3 }
 0x19b   :  { %v134_v5 = vpop.f32.mrf.mxu0 }
 0x19c   :  { %v143_v6 = vmul.f32 0.044715, %v138_v4  ;;  %v135_v7 = vadd.f32 %v243_v1, %v134_v5  ;;  %v141_v18 = vmul.f32 0.5, %v138_v4 }
 0x19e   :  { %v142_v8 = vmul.f32 0.044715, %v135_v7  ;;  %v145_v9 = vmul.f32 %v143_v6, %v138_v4  ;;  %v140_v22 = vmul.f32 0.5, %v135_v7 }
 0x1a0   :  { %v147_v10 = vmul.f32 %v145_v9, %v138_v4  ;;  %v144_v11 = vmul.f32 %v142_v8, %v135_v7 }
 0x1a2   :  { %v149_v12 = vadd.f32 %v147_v10, %v138_v4  ;;  %v146_v13 = vmul.f32 %v144_v11, %v135_v7 }
 0x1a4   :  { %v151_v14 = vmul.f32 0.7978846, %v149_v12  ;;  %v148_v15 = vadd.f32 %v146_v13, %v135_v7 }
 0x1a6   :  { %251 = vtanh.f32 %v151_v14  ;;  %v150_v16 = vmul.f32 0.7978846, %v148_v15 }
 0x1a8   :  { %253 = vtanh.f32 %v150_v16 }
 0x1ac   :  { %v252_v17 = vpop.eup %251 }
 0x1ad   :  { %v155_v19 = vadd.f32 1.0, %v252_v17 }
 0x1ae   :  { %v254_v20 = vpop.eup %253 }
 0x1af   :  { %v157_v21 = vmul.f32 %v155_v19, %v141_v18  ;;  %v154_v23 = vadd.f32 1.0, %v254_v20 }
 0x1b1   :  { %226 = vmatmul.msk.f32.vlgmr.msra.gmra.mxu2 %vm168_vm8, %v157_v21  ;;  %v156_v24 = vmul.f32 %v154_v23, %v140_v22 }
 0x1b3   :  { %225 = vmatmul.msk.f32.vlgmr.msra.gmra.mxu1 %vm168_vm8, %v156_v24 }
 0x230   :  { %v192_v26 = vpop.f32.mrf.mxu1 }
 0x231   :  { %v198_v27 = vadd.f32 %v192_v26, %v158_v25 }
 0x233   :  { %200 = vst.msk [vmem:[#allocation3] sm:$0xff] %vm34_vm0, %v198_v27 }
 0x234   :  { %v195_v29 = vpop.f32.mrf.mxu2 }
 0x235   :  { %v199_v30 = vadd.f32 %v195_v29, %v159_v28 }
 0x237   :  { %201 = vst.msk [vmem:[#allocation3 + $0x8] sm:$0xff] %vm34_vm0, %v199_v30 }
 0x23a   :  { %v205_v32 = vld [vmem:[#allocation3] sm:$0xff] }
 0x23b   :  { %v211_v33 = vadd.f32 %v244_v31, %v205_v32 }
 0x23d   :  { %v215_v34 = vadd.f32 %v307_v2, %v211_v33 }
 0x23e   :  { %v206_v35 = vld [vmem:[#allocation3 + $0x8] sm:$0xff] }
 0x23f   :  { %217 = vst.msk [vmem:[%s388_s7] sm:$0xff] %vm34_vm0, %v215_v34  ;;  %v212_v36 = vadd.f32 %v244_v31, %v206_v35 }
 0x241   :  { %v216_v37 = vadd.f32 %v212_v36, %v300_v0 }
 0x243   :  { %218 = vst.msk [vmem:[%s388_s7 + $0x8] sm:$0xff] %vm34_vm0, %v216_v37 }

// kernel: encoder_forward.11
= control target key start
LH: loop header
LB: loop body
LE: loop exit
PB: predicated region body
PF: predicated region fallthrough
CT: control target
= control target key end

     0   :  { %9 = vsyncpa [#allocation3], 0  ;;  %s120_s18 = smov [#allocation2]   ;;  %s121_s20 = smov 128   ;;  %s176_s0 = inlined_call_operand.vmem [shape: f32[16,32], index: 0, kind: input, shape index: {}]   ;;  %s177_s1 = inlined_call_operand.hbm [shape: f32[32,32], index: 1, kind: input, shape index: {}]   ;;  %s178_s2 = inlined_call_operand.vmem [shape: f32[1,32], index: 2, kind: input, shape index: {}]   ;;  %s179_s3 = inlined_call_operand.vmem [shape: f32[16,32], index: 3, kind: input, shape index: {}, may-alias: {3,4}]   ;;  %s180_s4 = inlined_call_operand.vmem [shape: f32[16,32], index: 4, kind: output, shape index: {}, may-alias: {3,4}]  }
   0x1   :  { %s16_s17 = sshll.u32 %s177_s1, 4  ;;  %s18_s19 = sshll.u32 %s120_s18, 4  ;;  %s17_s17 = int_to_ptr.hbm [resolvable:$true] %s16_s17  ;;  %s19_s19 = int_to_ptr.vmem [resolvable:$true] %s18_s19 }
   0x2   :  { %s122_s21 = smov 8  }
   0x3   :  { %24 = dma.hbm_to_vmem [thread:$0]  %s17_s17, 512, %s19_s19, [#allocation3], %s121_s20, %s121_s20, %s122_s21  }
   0x4   :  { %118 = dma.done.wait [#allocation3], 512  }
   0x5   :  { %119 = vsyncadd [#allocation3], 4294966784  ;;  %v38_v0 = vld [vmem:[#allocation2 + $0x18] sm:$0xff]  ;;  %v37_v1 = vld [vmem:[#allocation2 + $0x10] sm:$0xff]  ;;  %vm43_vm0 = vcmask 261120  }
   0x6   :  { %62 = vmatpush.msra.mxu0 %v38_v0  ;;  %86 = vmatpush.msra.mxu1 %v38_v0  ;;  %v36_v2 = vld [vmem:[#allocation2 + $0x8] sm:$0xff]  ;;  %v35_v3 = vld [vmem:[#allocation2] sm:$0xff] }
   0x7   :  { %v33_v4 = vld [vmem:[%s176_s0] sm:$0xff]  ;;  %v34_v5 = vld [vmem:[%s176_s0 + $0x8] sm:$0xff] }
   0x8   :  { %63 = vmatpush.msra.mxu0 %v37_v1  ;;  %87 = vmatpush.msra.mxu1 %v37_v1  ;;  %v93_v6 = vld [vmem:[%s178_s2] ss:$0 sm:$0xff]  ;;  %v74_v10 = vld [vmem:[%s179_s3 + $0x8] sm:$0xff] }
   0x9   :  { %v73_v8 = vld [vmem:[%s179_s3] sm:$0xff] }
   0xa   :  { %64 = vmatpush.msra.mxu0 %v36_v2  ;;  %88 = vmatpush.msra.mxu1 %v36_v2 }
   0xc   :  { %65 = vmatpush.msra.mxu0 %v35_v3  ;;  %89 = vmatpush.msra.mxu1 %v35_v3 }
   0xd   :  { %84 = vmatmul.msk.f32.vlgmr.msra.gmra.mxu0 %vm43_vm0, %v33_v4  ;;  %85 = vmatmul.msk.f32.vlgmr.msra.gmra.mxu1 %vm43_vm0, %v34_v5 }
  0x8a   :  { %v67_v7 = vpop.f32.mrf.mxu0  ;;  %v70_v9 = vpop.f32.mrf.mxu1 }
  0x8b   :  { %v68_v11 = vadd.f32 %v93_v6, %v67_v7  ;;  %v71_v12 = vadd.f32 %v93_v6, %v70_v9 }
  0x8d   :  { %v75_v13 = vadd.f32 %v73_v8, %v68_v11  ;;  %v76_v14 = vadd.f32 %v74_v10, %v71_v12 }
  0x8f   :  { %77 = vst.msk [vmem:[%s180_s4] sm:$0xff] %vm43_vm0, %v75_v13 }
  0x90   :  { %78 = vst.msk [vmem:[%s180_s4 + $0x8] sm:$0xff] %vm43_vm0, %v76_v14 }
  0x91   :  { %83 = vsyncpa [#allocation3], 1 }

// kernel: encoder_forward.17
= control target key start
LH: loop header
LB: loop body
LE: loop exit
PB: predicated region body
PF: predicated region fallthrough
CT: control target
= control target key end

     0   :  { %vm19_vm0 = vcmask 261120   ;;  %s184_s0 = inlined_call_operand.vmem [shape: f32[16,32], index: 0, kind: input, shape index: {}]   ;;  %s185_s1 = inlined_call_operand.vmem [shape: f32[1,32], index: 1, kind: input, shape index: {}]   ;;  %s186_s2 = inlined_call_operand.vmem [shape: f32[1,32], index: 2, kind: input, shape index: {}]   ;;  %s187_s3 = inlined_call_operand.hbm [shape: f32[16,32], index: 3, kind: output, shape index: {}]  }
   0x1   :  { %v15_v0 = vld [vmem:[%s184_s0] sm:$0xff] }
   0x2   :  { %v20_v1 = vsel %vm19_vm0, %v15_v0, 0.0 }
   0x3   :  { %8 = vsyncpa [#allocation3], 0  ;;  %21 = vadd.xlane.f32.xlu0 %v20_v1  ;;  %v16_v2 = vld [vmem:[%s184_s0 + $0x8] sm:$0xff]  ;;  %v139_v4 = vmov 32.0   ;;  %v105_v35 = vld [vmem:[%s185_s1] ss:$0 sm:$0xff] }
   0x4   :  { %v23_v3 = vsel %vm19_vm0, %v16_v2, 0.0  ;;  %107 = vrcp.f32 %v139_v4  ;;  %v106_v39 = vld [vmem:[%s186_s2] ss:$0 sm:$0xff]  ;;  %s140_s1 = smov [#allocation2]   ;;  %s89_s22 = sshll.u32 %s187_s3, 4  ;;  %s90_s22 = int_to_ptr.hbm [resolvable:$true] %s89_s22 }
   0x5   :  { %s87_s19 = sshll.u32 %s140_s1, 4  ;;  %s141_s2 = smov 128   ;;  %s88_s19 = int_to_ptr.vmem [resolvable:$true] %s87_s19 }
   0x6   :  { %s142_s23 = smov 8  }
   0xa   :  { %v108_v5 = vpop.eup %107 }
   0xb   :  { %24 = vadd.xlane.f32.xlu0 %v23_v3  ;;  %v27_v6 = vmul.f32 32.0, %v108_v5  ;;  %vm31_vm1 = vweird.f32 %v108_v5 }
   0xd   :  { %v28_v7 = vsub.f32 1.0, %v27_v6 }
   0xf   :  { %v29_v8 = vmul.f32 %v108_v5, %v28_v7 }
  0x11   :  { %v30_v9 = vadd.f32 %v108_v5, %v29_v8 }
  0x13   :  { %v32_v10 = vsel %vm31_vm1, %v108_v5, %v30_v9 }
  0x76   :  { %v22_v11 = vpop.xlane.xlu0 %21 }
  0x77   :  { %v33_v12 = vmul.f32 %v32_v10, %v22_v11 }
  0x79   :  { %v35_v13 = vsub.f32 %v15_v0, %v33_v12 }
  0x7b   :  { %v37_v14 = vmul.f32 %v35_v13, %v35_v13 }
  0x7d   :  { %v39_v15 = vsel %vm19_vm0, %v37_v14, 0.0 }
  0x7e   :  { %40 = vadd.xlane.f32.xlu1 %v39_v15  ;;  %v25_v16 = vpop.xlane.xlu0 %24 }
  0x7f   :  { %v34_v17 = vmul.f32 %v32_v10, %v25_v16 }
  0x81   :  { %v36_v18 = vsub.f32 %v16_v2, %v34_v17 }
  0x83   :  { %v38_v19 = vmul.f32 %v36_v18, %v36_v18 }
  0x85   :  { %v42_v20 = vsel %vm19_vm0, %v38_v19, 0.0 }
  0x86   :  { %43 = vadd.xlane.f32.xlu1 %v42_v20 }
  0xf1   :  { %v41_v21 = vpop.xlane.xlu1 %40 }
  0xf2   :  { %v45_v22 = vmul.f32 %v41_v21, %v32_v10 }
  0xf4   :  { %v47_v23 = vadd.f32 1e-05, %v45_v22 }
  0xf6   :  { %109 = vrsqrt.f32 %v47_v23  ;;  %vm55_vm3 = vweird.f32 %v47_v23 }
  0xf9   :  { %v44_v24 = vpop.xlane.xlu1 %43 }
  0xfa   :  { %v46_v25 = vmul.f32 %v44_v24, %v32_v10 }
  0xfc   :  { %v110_v26 = vpop.eup %109  ;;  %v48_v27 = vadd.f32 1e-05, %v46_v25 }
  0xfd   :  { %v50_v28 = vmul.f32 %v110_v26, %v47_v23  ;;  %vm56_vm2 = vweird.f32 %v110_v26 }
  0xfe   :  { %111 = vrsqrt.f32 %v48_v27  ;;  %vm57_vm4 = vmor %vm55_vm3, %vm56_vm2  ;;  %vm65_vm6 = vweird.f32 %v48_v27 }
  0xff   :  { %v51_v29 = vmul.f32 %v110_v26, %v50_v28 }
 0x101   :  { %v52_v30 = vmul.f32 0.5, %v51_v29 }
 0x103   :  { %v53_v31 = vsub.f32 1.5, %v52_v30 }
 0x104   :  { %v112_v32 = vpop.eup %111 }
 0x105   :  { %v54_v33 = vmul.f32 %v110_v26, %v53_v31  ;;  %v60_v34 = vmul.f32 %v112_v32, %v48_v27  ;;  %vm66_vm5 = vweird.f32 %v112_v32 }
 0x106   :  { %vm67_vm7 = vmor %vm65_vm6, %vm66_vm5 }
 0x107   :  { %v58_v36 = vsel %vm57_vm4, %v110_v26, %v54_v33  ;;  %v61_v37 = vmul.f32 %v112_v32, %v60_v34 }
 0x108   :  { %v69_v38 = vmul.f32 %v58_v36, %v35_v13 }
 0x109   :  { %v62_v40 = vmul.f32 0.5, %v61_v37 }
 0x10a   :  { %v74_v41 = vmul.f32 %v105_v35, %v69_v38 }
 0x10b   :  { %v63_v42 = vsub.f32 1.5, %v62_v40 }
 0x10c   :  { %v79_v43 = vadd.f32 %v106_v39, %v74_v41 }
 0x10d   :  { %v64_v44 = vmul.f32 %v112_v32, %v63_v42 }
 0x10e   :  { %81 = vst.msk [vmem:[#allocation2] sm:$0xff] %vm19_vm0, %v79_v43 }
 0x10f   :  { %v68_v45 = vsel %vm67_vm7, %v112_v32, %v64_v44 }
 0x110   :  { %v70_v46 = vmul.f32 %v68_v45, %v36_v18 }
 0x112   :  { %v75_v47 = vmul.f32 %v105_v35, %v70_v46 }
 0x114   :  { %v80_v48 = vadd.f32 %v106_v39, %v75_v47 }
 0x116   :  { %82 = vst.msk [vmem:[#allocation2 + $0x8] sm:$0xff] %vm19_vm0, %v80_v48 }
 0x117   :  { %95 = dma.vmem_to_hbm [thread:$0]  %s88_s19, 256, %s90_s22, [#allocation3], %s141_s2, %s141_s2, %s142_s23  }
 0x118   :  { %137 = dma.done.wait [#allocation3], 256  }
 0x119   :  { %138 = vsyncadd [#allocation3], 4294967040 }
 0x11a   :  { %100 = vsyncpa [#allocation3], 1 }

</bundles_post_ra>
